<compile_context>
chip_gen: v7x
topology: tpu7x:2x2x1
jax: 0.10.0
libtpu: 0.0.40
codegen_flags: <defaults>
</compile_context>

<pallas_src>
from collections import namedtuple

import jax
import jax.numpy as jnp
from jax.experimental import pallas as pl
from jax.experimental.pallas import tpu as pltpu

LIFState = namedtuple("LIFState", ["z", "v"])


def lif_seq_kernel(z_ref, w_ref, p_ref, c0_ref, z_out_ref, v_out_ref, carry_ref):
    """One grid step == TT timesteps of the LIF recurrence for one neuron tile.

    z_ref:     (TT*B, IN)   streamed input spikes (weight_dtype)
    w_ref:     (IN, tn)     Linear weight (transposed), VMEM-resident
    p_ref:     (3, tn)      f32 rows: bias, v_decay, thresh (resident)
    c0_ref:    (B, tn)      f32 initial carry = v0 * v_decay * (1 - z0)
    z_out_ref: (TT*B, tn)   per-block output spikes
    v_out_ref: (TT*B, tn)   per-block membrane potential
    carry_ref: (B, tn)      f32 VMEM scratch carrying the recurrence
    """
    B, tn = carry_ref.shape
    TT = z_out_ref.shape[0] // B

    # Time axis is grid axis 1 (innermost, "arbitrary"): (re)load the initial
    # carry at the start of every neuron tile's time sweep.
    @pl.when(pl.program_id(1) == 0)
    def _():
        carry_ref[...] = c0_ref[...]

    bias = p_ref[0:1, :]                                       # (1, tn)
    # Hoist the (1, tn) -> (B, tn) broadcasts out of the unrolled step loop.
    v_decay_b = jnp.broadcast_to(p_ref[1:2, :], (B, tn))
    thresh_b = jnp.broadcast_to(p_ref[2:3, :], (B, tn))

    # One batched MXU matmul for all TT timesteps (state-independent current).
    i_block = jnp.dot(z_ref[...], w_ref[...],
                      preferred_element_type=jnp.float32) + bias   # (TT*B, tn) f32

    carry = carry_ref[...]
    z_rows = []
    v_rows = []
    for s in range(TT):                       # fully unrolled at trace time
        i_s = i_block[s * B:(s + 1) * B, :]
        v = carry + i_s                       # == v_prev*decay*(1-z_prev) + i
        z_new = (v - thresh_b > 0.0).astype(jnp.float32)
        carry = v * v_decay_b * (1.0 - z_new)
        z_rows.append(z_new)
        v_rows.append(v)
    carry_ref[...] = carry

    # Single dense full-block stores (sublane/lane dense, unmasked vst).
    z_blk = z_rows[0] if TT == 1 else jnp.concatenate(z_rows, axis=0)
    v_blk = v_rows[0] if TT == 1 else jnp.concatenate(v_rows, axis=0)
    z_out_ref[...] = z_blk.astype(z_out_ref.dtype)
    v_out_ref[...] = v_blk.astype(v_out_ref.dtype)


def _pick_tt(T, B, target_rows):
    """Largest divisor of T with TT*B <= target_rows and layout-friendly rows."""
    cap = max(1, target_rows // max(B, 1))
    candidates = [tt for tt in range(1, T + 1)
                  if T % tt == 0 and tt <= cap and ((tt * B) % 8 == 0 or tt == T)]
    return max(candidates) if candidates else T


def lif_sequence(z_seq, w, b, v_decay, thresh, state_z=None, state_v=None, *,
                 tt=None, tn=None, weight_dtype=jnp.bfloat16,
                 z_trace_dtype=jnp.bfloat16, v_trace_dtype=jnp.float32,
                 target_rows=256):
    """Run T LIF timesteps in a single fused pallas_call.

    z_seq:              [T, B, in_features] input spikes (0/1 valued)
    w:                  [size, in_features] Linear weight (torch layout)
    b, v_decay, thresh: [size]
    state_z, state_v:   [B, size] initial state (None -> zeros)
    tt:                 timesteps per grid step (None -> aim for TT*B ~ target_rows;
                        use target_rows=128 on v5e, 256 on v6e/v7x)
    tn:                 output-neuron tile (None -> size); multiple of 128 enables
                        a "parallel" axis for v7x's two TensorCores
    weight_dtype:       bf16 (fast) or f32 (bit-parity with the PyTorch module)
    v_trace_dtype:      f32 default; bf16 halves the dominant HBM write
    returns (z_trace [T,B,size], v_trace [T,B,size])
    """
    T, B, in_f = z_seq.shape
    size = w.shape[0]

    if tt is None:
        tt = _pick_tt(T, B, target_rows)
    assert T % tt == 0, "tt must divide T"
    n_tblocks = T // tt
    block_rows = tt * B

    if tn is None:
        tn = size
    assert size % tn == 0 and (tn == size or tn % 128 == 0), "bad neuron tile"
    n_ntiles = size // tn

    w_t = w.T.astype(weight_dtype)                                   # [in_f, size]
    params = jnp.stack([b, v_decay, thresh]).astype(jnp.float32)     # [3, size]
    z2d = z_seq.reshape(T * B, in_f).astype(weight_dtype)            # [T*B, in_f]

    if state_z is None:
        state_z = jnp.zeros((B, size), jnp.float32)
    if state_v is None:
        state_v = jnp.zeros((B, size), jnp.float32)
    # Fold the initial state into a single resident carry: v0 * decay * (1 - z0).
    c0 = (state_v.astype(jnp.float32) * v_decay.astype(jnp.float32)
          * (1.0 - state_z.astype(jnp.float32)))                     # [B, size]

    out_shape = (jax.ShapeDtypeStruct((T * B, size), z_trace_dtype),
                 jax.ShapeDtypeStruct((T * B, size), v_trace_dtype))

    grid_spec = pltpu.PrefetchScalarGridSpec(
        num_scalar_prefetch=0,
        grid=(n_ntiles, n_tblocks),                       # (parallel, arbitrary)
        in_specs=[
            pl.BlockSpec((block_rows, in_f), lambda n, t: (t, 0)),  # streamed spikes
            pl.BlockSpec((in_f, tn), lambda n, t: (0, n)),          # resident weight
            pl.BlockSpec((3, tn), lambda n, t: (0, n)),             # resident params
            pl.BlockSpec((B, tn), lambda n, t: (0, n)),             # resident c0
        ],
        out_specs=(
            pl.BlockSpec((block_rows, tn), lambda n, t: (t, n)),    # z trace
            pl.BlockSpec((block_rows, tn), lambda n, t: (t, n)),    # v trace
        ),
        scratch_shapes=[pltpu.VMEM((B, tn), jnp.float32)],          # recurrent carry
    )

    # VMEM budgeting: only raise the scoped limit when the default (16 MiB on
    # v5e, 32 MiB on v6e/v7x) would be exceeded; cap at v7x's 64 MiB part.
    wbytes = jnp.dtype(weight_dtype).itemsize
    est = (2 * block_rows * in_f * wbytes                 # streamed input (dbl-buf)
           + 2 * in_f * tn * wbytes                       # weight
           + 2 * 3 * tn * 4 + 2 * B * tn * 4              # params + c0
           + 2 * block_rows * tn * (jnp.dtype(z_trace_dtype).itemsize
                                    + jnp.dtype(v_trace_dtype).itemsize)
           + B * tn * 4                                   # carry scratch
           + block_rows * tn * 4)                         # i_block temporaries
    cp_kwargs = dict(dimension_semantics=("parallel", "arbitrary"))
    if est > (16 << 20):
        cp_kwargs["vmem_limit_bytes"] = min(int(est * 1.25), 64 << 20)

    z2_tr, v2_tr = pl.pallas_call(
        lif_seq_kernel,
        out_shape=out_shape,
        grid_spec=grid_spec,
        compiler_params=pltpu.CompilerParams(**cp_kwargs),
    )(z2d, w_t, params, c0)

    return z2_tr.reshape(T, B, size), v2_tr.reshape(T, B, size)


def lif_forward(z, w, b, v_decay, thresh, state=None):
    """Single LIF step with the module's (z, LIFState) return convention."""
    B = z.shape[0]
    size = w.shape[0]
    if state is None:
        zeros = jnp.zeros((B, size), jnp.float32)
        state = LIFState(z=zeros, v=zeros)
    z_tr, v_tr = lif_sequence(z[None], w, b, v_decay, thresh, state.z, state.v)
    z_new = z_tr[0].astype(jnp.float32)
    return z_new, LIFState(z_new, v_tr[0])


def lif_reference_seq(z_seq, w, b, v_decay, thresh, state_z, state_v,
                      weight_dtype=jnp.bfloat16):
    """Pure-JAX reference using the same matmul operand dtypes as the kernel."""
    w_t = w.T.astype(weight_dtype)
    z_cast = z_seq.astype(weight_dtype)

    def step(carry, z_t):
        sz, sv = carry
        i = jnp.dot(z_t, w_t, preferred_element_type=jnp.float32) + b
        v = sv * v_decay * (1.0 - sz) + i
        z_new = (v - thresh > 0.0).astype(jnp.float32)
        return (z_new, v), (z_new, v)

    (_, _), (z_trace, v_trace) = jax.lax.scan(step, (state_z, state_v), z_cast)
    return z_trace, v_trace


if __name__ == "__main__":
    key = jax.random.PRNGKey(0)
    k_w, k_b, k_vd, k_th, k_z, k_sz, k_sv = jax.random.split(key, 7)

    B = 8        # batch
    IN = 128     # synapse in_features
    SIZE = 128   # LIF layer size
    T = 64       # timesteps fused into one launch (TT=32 per grid step here)

    # Deterministic parameter init (mirrors the module's __init__ ranges).
    lim = 1.0 / jnp.sqrt(jnp.float32(IN))
    w = jax.random.uniform(k_w, (SIZE, IN), jnp.float32, -lim, lim)   # torch layout
    b = jax.random.uniform(k_b, (SIZE,), jnp.float32, -lim, lim)
    v_decay = jax.random.uniform(k_vd, (SIZE,), jnp.float32, 0.1, 0.7)
    thresh = jax.random.uniform(k_th, (SIZE,), jnp.float32, 0.7, 0.95)

    # Inputs: binary spike train and a previous LIF state.
    z_seq = (jax.random.uniform(k_z, (T, B, IN)) > 0.5).astype(jnp.float32)
    state_z = (jax.random.uniform(k_sz, (B, SIZE)) > 0.5).astype(jnp.float32)
    state_v = jax.random.normal(k_sv, (B, SIZE), jnp.float32)

    # Fused T-step recurrence: one launch, batched matmul, carry in scratch.
    z_tr, v_tr = lif_sequence(z_seq, w, b, v_decay, thresh, state_z, state_v)
    jax.block_until_ready((z_tr, v_tr))

    z_ref, v_ref = lif_reference_seq(z_seq, w, b, v_decay, thresh,
                                     state_z, state_v,
                                     weight_dtype=jnp.bfloat16)
    assert jnp.array_equal(z_tr.astype(jnp.float32), z_ref), "spike trace mismatch"
    assert jnp.allclose(v_tr, v_ref, atol=1e-4), "membrane potential mismatch"

    # Single-step module-style call with state=None (zero initial state).
    z1, st1 = lif_forward(z_seq[0], w, b, v_decay, thresh, state=None)
    jax.block_until_ready((z1, st1.v))
    zeros = jnp.zeros((B, SIZE), jnp.float32)
    z1_ref, v1_ref = lif_reference_seq(z_seq[:1], w, b, v_decay, thresh,
                                       zeros, zeros, weight_dtype=jnp.bfloat16)
    assert jnp.array_equal(z1, z1_ref[0]), "single-step spike mismatch"
    assert jnp.allclose(st1.v, v1_ref[0], atol=1e-4), "single-step v mismatch"

    print("KERNEL_OK")
</pallas_src>

<mosaic_0001>
module attributes {stable_mosaic.version = 11 : i64} {
  func.func @lif_seq_kernel(%arg0: i32, %arg1: i32, %arg2: memref<256x128xbf16, #tpu.memory_space<vmem>>, %arg3: memref<128x128xbf16, #tpu.memory_space<vmem>>, %arg4: memref<3x128xf32, #tpu.memory_space<vmem>>, %arg5: memref<8x128xf32, #tpu.memory_space<vmem>>, %arg6: memref<256x128xbf16, #tpu.memory_space<vmem>>, %arg7: memref<256x128xf32, #tpu.memory_space<vmem>>, %arg8: memref<8x128xf32, #tpu.memory_space<vmem>>) attributes {dimension_semantics = [#tpu.dimension_semantics<parallel>, #tpu.dimension_semantics<arbitrary>], iteration_bounds = array<i64: 1, 2>, scalar_prefetch = 0 : i64, scratch_operands = 1 : i64, tpu.core_type = #tpu.core_type<tc>, window_params = [{transform_indices = @transform_0, window_bounds = array<i64: 256, 128>}, {transform_indices = @transform_1, window_bounds = array<i64: 128, 128>}, {transform_indices = @transform_2, window_bounds = array<i64: 3, 128>}, {transform_indices = @transform_3, window_bounds = array<i64: 8, 128>}, {transform_indices = @transform_4, window_bounds = array<i64: 256, 128>}, {transform_indices = @transform_5, window_bounds = array<i64: 256, 128>}]} {
    %c0_i32 = arith.constant 0 : i32
    %0 = arith.cmpi eq, %arg1, %c0_i32 : i32
    %1 = arith.extui %0 : i1 to i32
    %c0_i32_0 = arith.constant 0 : i32
    %2 = arith.cmpi ne, %1, %c0_i32_0 : i32
    scf.if %2 {
      %c0_80 = arith.constant 0 : index
      %c0_81 = arith.constant 0 : index
      %378 = vector.load %arg5[%c0_80, %c0_81] : memref<8x128xf32, #tpu.memory_space<vmem>>, vector<8x128xf32>
      %c0_82 = arith.constant 0 : index
      %c0_83 = arith.constant 0 : index
      %379 = vector.load %arg8[%c0_82, %c0_83] : memref<8x128xf32, #tpu.memory_space<vmem>>, vector<8x128xf32>
      tpu.vector_store %arg8[%c0_82, %c0_83], %378 {strides = array<i32>} : memref<8x128xf32, #tpu.memory_space<vmem>>, vector<8x128xf32>,
    } else {
    }
    %c0 = arith.constant 0 : index
    %c0_1 = arith.constant 0 : index
    %3 = vector.load %arg4[%c0, %c0_1] : memref<3x128xf32, #tpu.memory_space<vmem>>, vector<1x128xf32>
    %c1 = arith.constant 1 : index
    %c0_2 = arith.constant 0 : index
    %4 = vector.load %arg4[%c1, %c0_2] : memref<3x128xf32, #tpu.memory_space<vmem>>, vector<1x128xf32>
    %5 = vector.shape_cast %4 : vector<1x128xf32> to vector<1x128xf32>
    %6 = vector.broadcast %5 : vector<1x128xf32> to vector<8x128xf32>
    %c2 = arith.constant 2 : index
    %c0_3 = arith.constant 0 : index
    %7 = vector.load %arg4[%c2, %c0_3] : memref<3x128xf32, #tpu.memory_space<vmem>>, vector<1x128xf32>
    %8 = vector.shape_cast %7 : vector<1x128xf32> to vector<1x128xf32>
    %9 = vector.broadcast %8 : vector<1x128xf32> to vector<8x128xf32>
    %c0_4 = arith.constant 0 : index
    %c0_5 = arith.constant 0 : index
    %10 = vector.load %arg2[%c0_4, %c0_5] : memref<256x128xbf16, #tpu.memory_space<vmem>>, vector<256x128xbf16>
    %c0_6 = arith.constant 0 : index
    %c0_7 = arith.constant 0 : index
    %11 = vector.load %arg3[%c0_6, %c0_7] : memref<128x128xbf16, #tpu.memory_space<vmem>>, vector<128x128xbf16>
    %cst = arith.constant dense<0.000000e+00> : vector<256x128xf32>
    %12 = tpu.matmul %10, %11, %cst {dimension_numbers = #tpu.dot_dimension_numbers<[1], [0], [0], [1], [0, 0, 1, 1], [], []>} : vector<256x128xbf16>, vector<128x128xbf16>, vector<256x128xf32> -> vector<256x128xf32>
    %13 = vector.broadcast %3 : vector<1x128xf32> to vector<256x128xf32>
    %14 = arith.addf %12, %13 : vector<256x128xf32>
    %c0_8 = arith.constant 0 : index
    %c0_9 = arith.constant 0 : index
    %15 = vector.load %arg8[%c0_8, %c0_9] : memref<8x128xf32, #tpu.memory_space<vmem>>, vector<8x128xf32>
    %16 = vector.extract_strided_slice %14 {offsets = [0, 0], sizes = [8, 128], strides = [1, 1]} : vector<256x128xf32> to vector<8x128xf32>
    %17 = arith.addf %15, %16 : vector<8x128xf32>
    %18 = arith.subf %17, %9 : vector<8x128xf32>
    %cst_10 = arith.constant 0.000000e+00 : f32
    %19 = vector.broadcast %cst_10 : f32 to vector<8x128xf32>
    %20 = arith.cmpf ogt, %18, %19 : vector<8x128xf32>
    %21 = arith.extui %20 : vector<8x128xi1> to vector<8x128xi32>
    %22 = arith.sitofp %21 : vector<8x128xi32> to vector<8x128xf32>
    %23 = arith.mulf %17, %6 : vector<8x128xf32>
    %cst_11 = arith.constant 1.000000e+00 : f32
    %24 = vector.broadcast %cst_11 : f32 to vector<8x128xf32>
    %25 = arith.subf %24, %22 : vector<8x128xf32>
    %26 = arith.mulf %23, %25 : vector<8x128xf32>
    %27 = vector.extract_strided_slice %14 {offsets = [8, 0], sizes = [8, 128], strides = [1, 1]} : vector<256x128xf32> to vector<8x128xf32>
    %28 = arith.addf %26, %27 : vector<8x128xf32>
    %29 = arith.subf %28, %9 : vector<8x128xf32>
    %cst_12 = arith.constant 0.000000e+00 : f32
    %30 = vector.broadcast %cst_12 : f32 to vector<8x128xf32>
    %31 = arith.cmpf ogt, %29, %30 : vector<8x128xf32>
    %32 = arith.extui %31 : vector<8x128xi1> to vector<8x128xi32>
    %33 = arith.sitofp %32 : vector<8x128xi32> to vector<8x128xf32>
    %34 = arith.mulf %28, %6 : vector<8x128xf32>
    %cst_13 = arith.constant 1.000000e+00 : f32
    %35 = vector.broadcast %cst_13 : f32 to vector<8x128xf32>
    %36 = arith.subf %35, %33 : vector<8x128xf32>
    %37 = arith.mulf %34, %36 : vector<8x128xf32>
    %38 = vector.extract_strided_slice %14 {offsets = [16, 0], sizes = [8, 128], strides = [1, 1]} : vector<256x128xf32> to vector<8x128xf32>
    %39 = arith.addf %37, %38 : vector<8x128xf32>
    %40 = arith.subf %39, %9 : vector<8x128xf32>
    %cst_14 = arith.constant 0.000000e+00 : f32
    %41 = vector.broadcast %cst_14 : f32 to vector<8x128xf32>
    %42 = arith.cmpf ogt, %40, %41 : vector<8x128xf32>
    %43 = arith.extui %42 : vector<8x128xi1> to vector<8x128xi32>
    %44 = arith.sitofp %43 : vector<8x128xi32> to vector<8x128xf32>
    %45 = arith.mulf %39, %6 : vector<8x128xf32>
    %cst_15 = arith.constant 1.000000e+00 : f32
    %46 = vector.broadcast %cst_15 : f32 to vector<8x128xf32>
    %47 = arith.subf %46, %44 : vector<8x128xf32>
    %48 = arith.mulf %45, %47 : vector<8x128xf32>
    %49 = vector.extract_strided_slice %14 {offsets = [24, 0], sizes = [8, 128], strides = [1, 1]} : vector<256x128xf32> to vector<8x128xf32>
    %50 = arith.addf %48, %49 : vector<8x128xf32>
    %51 = arith.subf %50, %9 : vector<8x128xf32>
    %cst_16 = arith.constant 0.000000e+00 : f32
    %52 = vector.broadcast %cst_16 : f32 to vector<8x128xf32>
    %53 = arith.cmpf ogt, %51, %52 : vector<8x128xf32>
    %54 = arith.extui %53 : vector<8x128xi1> to vector<8x128xi32>
    %55 = arith.sitofp %54 : vector<8x128xi32> to vector<8x128xf32>
    %56 = arith.mulf %50, %6 : vector<8x128xf32>
    %cst_17 = arith.constant 1.000000e+00 : f32
    %57 = vector.broadcast %cst_17 : f32 to vector<8x128xf32>
    %58 = arith.subf %57, %55 : vector<8x128xf32>
    %59 = arith.mulf %56, %58 : vector<8x128xf32>
    %60 = vector.extract_strided_slice %14 {offsets = [32, 0], sizes = [8, 128], strides = [1, 1]} : vector<256x128xf32> to vector<8x128xf32>
    %61 = arith.addf %59, %60 : vector<8x128xf32>
    %62 = arith.subf %61, %9 : vector<8x128xf32>
    %cst_18 = arith.constant 0.000000e+00 : f32
    %63 = vector.broadcast %cst_18 : f32 to vector<8x128xf32>
    %64 = arith.cmpf ogt, %62, %63 : vector<8x128xf32>
    %65 = arith.extui %64 : vector<8x128xi1> to vector<8x128xi32>
    %66 = arith.sitofp %65 : vector<8x128xi32> to vector<8x128xf32>
    %67 = arith.mulf %61, %6 : vector<8x128xf32>
    %cst_19 = arith.constant 1.000000e+00 : f32
    %68 = vector.broadcast %cst_19 : f32 to vector<8x128xf32>
    %69 = arith.subf %68, %66 : vector<8x128xf32>
    %70 = arith.mulf %67, %69 : vector<8x128xf32>
    %71 = vector.extract_strided_slice %14 {offsets = [40, 0], sizes = [8, 128], strides = [1, 1]} : vector<256x128xf32> to vector<8x128xf32>
    %72 = arith.addf %70, %71 : vector<8x128xf32>
    %73 = arith.subf %72, %9 : vector<8x128xf32>
    %cst_20 = arith.constant 0.000000e+00 : f32
    %74 = vector.broadcast %cst_20 : f32 to vector<8x128xf32>
    %75 = arith.cmpf ogt, %73, %74 : vector<8x128xf32>
    %76 = arith.extui %75 : vector<8x128xi1> to vector<8x128xi32>
    %77 = arith.sitofp %76 : vector<8x128xi32> to vector<8x128xf32>
    %78 = arith.mulf %72, %6 : vector<8x128xf32>
    %cst_21 = arith.constant 1.000000e+00 : f32
    %79 = vector.broadcast %cst_21 : f32 to vector<8x128xf32>
    %80 = arith.subf %79, %77 : vector<8x128xf32>
    %81 = arith.mulf %78, %80 : vector<8x128xf32>
    %82 = vector.extract_strided_slice %14 {offsets = [48, 0], sizes = [8, 128], strides = [1, 1]} : vector<256x128xf32> to vector<8x128xf32>
    %83 = arith.addf %81, %82 : vector<8x128xf32>
    %84 = arith.subf %83, %9 : vector<8x128xf32>
    %cst_22 = arith.constant 0.000000e+00 : f32
    %85 = vector.broadcast %cst_22 : f32 to vector<8x128xf32>
    %86 = arith.cmpf ogt, %84, %85 : vector<8x128xf32>
    %87 = arith.extui %86 : vector<8x128xi1> to vector<8x128xi32>
    %88 = arith.sitofp %87 : vector<8x128xi32> to vector<8x128xf32>
    %89 = arith.mulf %83, %6 : vector<8x128xf32>
    %cst_23 = arith.constant 1.000000e+00 : f32
    %90 = vector.broadcast %cst_23 : f32 to vector<8x128xf32>
    %91 = arith.subf %90, %88 : vector<8x128xf32>
    %92 = arith.mulf %89, %91 : vector<8x128xf32>
    %93 = vector.extract_strided_slice %14 {offsets = [56, 0], sizes = [8, 128], strides = [1, 1]} : vector<256x128xf32> to vector<8x128xf32>
    %94 = arith.addf %92, %93 : vector<8x128xf32>
    %95 = arith.subf %94, %9 : vector<8x128xf32>
    %cst_24 = arith.constant 0.000000e+00 : f32
    %96 = vector.broadcast %cst_24 : f32 to vector<8x128xf32>
    %97 = arith.cmpf ogt, %95, %96 : vector<8x128xf32>
    %98 = arith.extui %97 : vector<8x128xi1> to vector<8x128xi32>
    %99 = arith.sitofp %98 : vector<8x128xi32> to vector<8x128xf32>
    %100 = arith.mulf %94, %6 : vector<8x128xf32>
    %cst_25 = arith.constant 1.000000e+00 : f32
    %101 = vector.broadcast %cst_25 : f32 to vector<8x128xf32>
    %102 = arith.subf %101, %99 : vector<8x128xf32>
    %103 = arith.mulf %100, %102 : vector<8x128xf32>
    %104 = vector.extract_strided_slice %14 {offsets = [64, 0], sizes = [8, 128], strides = [1, 1]} : vector<256x128xf32> to vector<8x128xf32>
    %105 = arith.addf %103, %104 : vector<8x128xf32>
    %106 = arith.subf %105, %9 : vector<8x128xf32>
    %cst_26 = arith.constant 0.000000e+00 : f32
    %107 = vector.broadcast %cst_26 : f32 to vector<8x128xf32>
    %108 = arith.cmpf ogt, %106, %107 : vector<8x128xf32>
    %109 = arith.extui %108 : vector<8x128xi1> to vector<8x128xi32>
    %110 = arith.sitofp %109 : vector<8x128xi32> to vector<8x128xf32>
    %111 = arith.mulf %105, %6 : vector<8x128xf32>
    %cst_27 = arith.constant 1.000000e+00 : f32
    %112 = vector.broadcast %cst_27 : f32 to vector<8x128xf32>
    %113 = arith.subf %112, %110 : vector<8x128xf32>
    %114 = arith.mulf %111, %113 : vector<8x128xf32>
    %115 = vector.extract_strided_slice %14 {offsets = [72, 0], sizes = [8, 128], strides = [1, 1]} : vector<256x128xf32> to vector<8x128xf32>
    %116 = arith.addf %114, %115 : vector<8x128xf32>
    %117 = arith.subf %116, %9 : vector<8x128xf32>
    %cst_28 = arith.constant 0.000000e+00 : f32
    %118 = vector.broadcast %cst_28 : f32 to vector<8x128xf32>
    %119 = arith.cmpf ogt, %117, %118 : vector<8x128xf32>
    %120 = arith.extui %119 : vector<8x128xi1> to vector<8x128xi32>
    %121 = arith.sitofp %120 : vector<8x128xi32> to vector<8x128xf32>
    %122 = arith.mulf %116, %6 : vector<8x128xf32>
    %cst_29 = arith.constant 1.000000e+00 : f32
    %123 = vector.broadcast %cst_29 : f32 to vector<8x128xf32>
    %124 = arith.subf %123, %121 : vector<8x128xf32>
    %125 = arith.mulf %122, %124 : vector<8x128xf32>
    %126 = vector.extract_strided_slice %14 {offsets = [80, 0], sizes = [8, 128], strides = [1, 1]} : vector<256x128xf32> to vector<8x128xf32>
    %127 = arith.addf %125, %126 : vector<8x128xf32>
    %128 = arith.subf %127, %9 : vector<8x128xf32>
    %cst_30 = arith.constant 0.000000e+00 : f32
    %129 = vector.broadcast %cst_30 : f32 to vector<8x128xf32>
    %130 = arith.cmpf ogt, %128, %129 : vector<8x128xf32>
    %131 = arith.extui %130 : vector<8x128xi1> to vector<8x128xi32>
    %132 = arith.sitofp %131 : vector<8x128xi32> to vector<8x128xf32>
    %133 = arith.mulf %127, %6 : vector<8x128xf32>
    %cst_31 = arith.constant 1.000000e+00 : f32
    %134 = vector.broadcast %cst_31 : f32 to vector<8x128xf32>
    %135 = arith.subf %134, %132 : vector<8x128xf32>
    %136 = arith.mulf %133, %135 : vector<8x128xf32>
    %137 = vector.extract_strided_slice %14 {offsets = [88, 0], sizes = [8, 128], strides = [1, 1]} : vector<256x128xf32> to vector<8x128xf32>
    %138 = arith.addf %136, %137 : vector<8x128xf32>
    %139 = arith.subf %138, %9 : vector<8x128xf32>
    %cst_32 = arith.constant 0.000000e+00 : f32
    %140 = vector.broadcast %cst_32 : f32 to vector<8x128xf32>
    %141 = arith.cmpf ogt, %139, %140 : vector<8x128xf32>
    %142 = arith.extui %141 : vector<8x128xi1> to vector<8x128xi32>
    %143 = arith.sitofp %142 : vector<8x128xi32> to vector<8x128xf32>
    %144 = arith.mulf %138, %6 : vector<8x128xf32>
    %cst_33 = arith.constant 1.000000e+00 : f32
    %145 = vector.broadcast %cst_33 : f32 to vector<8x128xf32>
    %146 = arith.subf %145, %143 : vector<8x128xf32>
    %147 = arith.mulf %144, %146 : vector<8x128xf32>
    %148 = vector.extract_strided_slice %14 {offsets = [96, 0], sizes = [8, 128], strides = [1, 1]} : vector<256x128xf32> to vector<8x128xf32>
    %149 = arith.addf %147, %148 : vector<8x128xf32>
    %150 = arith.subf %149, %9 : vector<8x128xf32>
    %cst_34 = arith.constant 0.000000e+00 : f32
    %151 = vector.broadcast %cst_34 : f32 to vector<8x128xf32>
    %152 = arith.cmpf ogt, %150, %151 : vector<8x128xf32>
    %153 = arith.extui %152 : vector<8x128xi1> to vector<8x128xi32>
    %154 = arith.sitofp %153 : vector<8x128xi32> to vector<8x128xf32>
    %155 = arith.mulf %149, %6 : vector<8x128xf32>
    %cst_35 = arith.constant 1.000000e+00 : f32
    %156 = vector.broadcast %cst_35 : f32 to vector<8x128xf32>
    %157 = arith.subf %156, %154 : vector<8x128xf32>
    %158 = arith.mulf %155, %157 : vector<8x128xf32>
    %159 = vector.extract_strided_slice %14 {offsets = [104, 0], sizes = [8, 128], strides = [1, 1]} : vector<256x128xf32> to vector<8x128xf32>
    %160 = arith.addf %158, %159 : vector<8x128xf32>
    %161 = arith.subf %160, %9 : vector<8x128xf32>
    %cst_36 = arith.constant 0.000000e+00 : f32
    %162 = vector.broadcast %cst_36 : f32 to vector<8x128xf32>
    %163 = arith.cmpf ogt, %161, %162 : vector<8x128xf32>
    %164 = arith.extui %163 : vector<8x128xi1> to vector<8x128xi32>
    %165 = arith.sitofp %164 : vector<8x128xi32> to vector<8x128xf32>
    %166 = arith.mulf %160, %6 : vector<8x128xf32>
    %cst_37 = arith.constant 1.000000e+00 : f32
    %167 = vector.broadcast %cst_37 : f32 to vector<8x128xf32>
    %168 = arith.subf %167, %165 : vector<8x128xf32>
    %169 = arith.mulf %166, %168 : vector<8x128xf32>
    %170 = vector.extract_strided_slice %14 {offsets = [112, 0], sizes = [8, 128], strides = [1, 1]} : vector<256x128xf32> to vector<8x128xf32>
    %171 = arith.addf %169, %170 : vector<8x128xf32>
    %172 = arith.subf %171, %9 : vector<8x128xf32>
    %cst_38 = arith.constant 0.000000e+00 : f32
    %173 = vector.broadcast %cst_38 : f32 to vector<8x128xf32>
    %174 = arith.cmpf ogt, %172, %173 : vector<8x128xf32>
    %175 = arith.extui %174 : vector<8x128xi1> to vector<8x128xi32>
    %176 = arith.sitofp %175 : vector<8x128xi32> to vector<8x128xf32>
    %177 = arith.mulf %171, %6 : vector<8x128xf32>
    %cst_39 = arith.constant 1.000000e+00 : f32
    %178 = vector.broadcast %cst_39 : f32 to vector<8x128xf32>
    %179 = arith.subf %178, %176 : vector<8x128xf32>
    %180 = arith.mulf %177, %179 : vector<8x128xf32>
    %181 = vector.extract_strided_slice %14 {offsets = [120, 0], sizes = [8, 128], strides = [1, 1]} : vector<256x128xf32> to vector<8x128xf32>
    %182 = arith.addf %180, %181 : vector<8x128xf32>
    %183 = arith.subf %182, %9 : vector<8x128xf32>
    %cst_40 = arith.constant 0.000000e+00 : f32
    %184 = vector.broadcast %cst_40 : f32 to vector<8x128xf32>
    %185 = arith.cmpf ogt, %183, %184 : vector<8x128xf32>
    %186 = arith.extui %185 : vector<8x128xi1> to vector<8x128xi32>
    %187 = arith.sitofp %186 : vector<8x128xi32> to vector<8x128xf32>
    %188 = arith.mulf %182, %6 : vector<8x128xf32>
    %cst_41 = arith.constant 1.000000e+00 : f32
    %189 = vector.broadcast %cst_41 : f32 to vector<8x128xf32>
    %190 = arith.subf %189, %187 : vector<8x128xf32>
    %191 = arith.mulf %188, %190 : vector<8x128xf32>
    %192 = vector.extract_strided_slice %14 {offsets = [128, 0], sizes = [8, 128], strides = [1, 1]} : vector<256x128xf32> to vector<8x128xf32>
    %193 = arith.addf %191, %192 : vector<8x128xf32>
    %194 = arith.subf %193, %9 : vector<8x128xf32>
    %cst_42 = arith.constant 0.000000e+00 : f32
    %195 = vector.broadcast %cst_42 : f32 to vector<8x128xf32>
    %196 = arith.cmpf ogt, %194, %195 : vector<8x128xf32>
    %197 = arith.extui %196 : vector<8x128xi1> to vector<8x128xi32>
    %198 = arith.sitofp %197 : vector<8x128xi32> to vector<8x128xf32>
    %199 = arith.mulf %193, %6 : vector<8x128xf32>
    %cst_43 = arith.constant 1.000000e+00 : f32
    %200 = vector.broadcast %cst_43 : f32 to vector<8x128xf32>
    %201 = arith.subf %200, %198 : vector<8x128xf32>
    %202 = arith.mulf %199, %201 : vector<8x128xf32>
    %203 = vector.extract_strided_slice %14 {offsets = [136, 0], sizes = [8, 128], strides = [1, 1]} : vector<256x128xf32> to vector<8x128xf32>
    %204 = arith.addf %202, %203 : vector<8x128xf32>
    %205 = arith.subf %204, %9 : vector<8x128xf32>
    %cst_44 = arith.constant 0.000000e+00 : f32
    %206 = vector.broadcast %cst_44 : f32 to vector<8x128xf32>
    %207 = arith.cmpf ogt, %205, %206 : vector<8x128xf32>
    %208 = arith.extui %207 : vector<8x128xi1> to vector<8x128xi32>
    %209 = arith.sitofp %208 : vector<8x128xi32> to vector<8x128xf32>
    %210 = arith.mulf %204, %6 : vector<8x128xf32>
    %cst_45 = arith.constant 1.000000e+00 : f32
    %211 = vector.broadcast %cst_45 : f32 to vector<8x128xf32>
    %212 = arith.subf %211, %209 : vector<8x128xf32>
    %213 = arith.mulf %210, %212 : vector<8x128xf32>
    %214 = vector.extract_strided_slice %14 {offsets = [144, 0], sizes = [8, 128], strides = [1, 1]} : vector<256x128xf32> to vector<8x128xf32>
    %215 = arith.addf %213, %214 : vector<8x128xf32>
    %216 = arith.subf %215, %9 : vector<8x128xf32>
    %cst_46 = arith.constant 0.000000e+00 : f32
    %217 = vector.broadcast %cst_46 : f32 to vector<8x128xf32>
    %218 = arith.cmpf ogt, %216, %217 : vector<8x128xf32>
    %219 = arith.extui %218 : vector<8x128xi1> to vector<8x128xi32>
    %220 = arith.sitofp %219 : vector<8x128xi32> to vector<8x128xf32>
    %221 = arith.mulf %215, %6 : vector<8x128xf32>
    %cst_47 = arith.constant 1.000000e+00 : f32
    %222 = vector.broadcast %cst_47 : f32 to vector<8x128xf32>
    %223 = arith.subf %222, %220 : vector<8x128xf32>
    %224 = arith.mulf %221, %223 : vector<8x128xf32>
    %225 = vector.extract_strided_slice %14 {offsets = [152, 0], sizes = [8, 128], strides = [1, 1]} : vector<256x128xf32> to vector<8x128xf32>
    %226 = arith.addf %224, %225 : vector<8x128xf32>
    %227 = arith.subf %226, %9 : vector<8x128xf32>
    %cst_48 = arith.constant 0.000000e+00 : f32
    %228 = vector.broadcast %cst_48 : f32 to vector<8x128xf32>
    %229 = arith.cmpf ogt, %227, %228 : vector<8x128xf32>
    %230 = arith.extui %229 : vector<8x128xi1> to vector<8x128xi32>
    %231 = arith.sitofp %230 : vector<8x128xi32> to vector<8x128xf32>
    %232 = arith.mulf %226, %6 : vector<8x128xf32>
    %cst_49 = arith.constant 1.000000e+00 : f32
    %233 = vector.broadcast %cst_49 : f32 to vector<8x128xf32>
    %234 = arith.subf %233, %231 : vector<8x128xf32>
    %235 = arith.mulf %232, %234 : vector<8x128xf32>
    %236 = vector.extract_strided_slice %14 {offsets = [160, 0], sizes = [8, 128], strides = [1, 1]} : vector<256x128xf32> to vector<8x128xf32>
    %237 = arith.addf %235, %236 : vector<8x128xf32>
    %238 = arith.subf %237, %9 : vector<8x128xf32>
    %cst_50 = arith.constant 0.000000e+00 : f32
    %239 = vector.broadcast %cst_50 : f32 to vector<8x128xf32>
    %240 = arith.cmpf ogt, %238, %239 : vector<8x128xf32>
    %241 = arith.extui %240 : vector<8x128xi1> to vector<8x128xi32>
    %242 = arith.sitofp %241 : vector<8x128xi32> to vector<8x128xf32>
    %243 = arith.mulf %237, %6 : vector<8x128xf32>
    %cst_51 = arith.constant 1.000000e+00 : f32
    %244 = vector.broadcast %cst_51 : f32 to vector<8x128xf32>
    %245 = arith.subf %244, %242 : vector<8x128xf32>
    %246 = arith.mulf %243, %245 : vector<8x128xf32>
    %247 = vector.extract_strided_slice %14 {offsets = [168, 0], sizes = [8, 128], strides = [1, 1]} : vector<256x128xf32> to vector<8x128xf32>
    %248 = arith.addf %246, %247 : vector<8x128xf32>
    %249 = arith.subf %248, %9 : vector<8x128xf32>
    %cst_52 = arith.constant 0.000000e+00 : f32
    %250 = vector.broadcast %cst_52 : f32 to vector<8x128xf32>
    %251 = arith.cmpf ogt, %249, %250 : vector<8x128xf32>
    %252 = arith.extui %251 : vector<8x128xi1> to vector<8x128xi32>
    %253 = arith.sitofp %252 : vector<8x128xi32> to vector<8x128xf32>
    %254 = arith.mulf %248, %6 : vector<8x128xf32>
    %cst_53 = arith.constant 1.000000e+00 : f32
    %255 = vector.broadcast %cst_53 : f32 to vector<8x128xf32>
    %256 = arith.subf %255, %253 : vector<8x128xf32>
    %257 = arith.mulf %254, %256 : vector<8x128xf32>
    %258 = vector.extract_strided_slice %14 {offsets = [176, 0], sizes = [8, 128], strides = [1, 1]} : vector<256x128xf32> to vector<8x128xf32>
    %259 = arith.addf %257, %258 : vector<8x128xf32>
    %260 = arith.subf %259, %9 : vector<8x128xf32>
    %cst_54 = arith.constant 0.000000e+00 : f32
    %261 = vector.broadcast %cst_54 : f32 to vector<8x128xf32>
    %262 = arith.cmpf ogt, %260, %261 : vector<8x128xf32>
    %263 = arith.extui %262 : vector<8x128xi1> to vector<8x128xi32>
    %264 = arith.sitofp %263 : vector<8x128xi32> to vector<8x128xf32>
    %265 = arith.mulf %259, %6 : vector<8x128xf32>
    %cst_55 = arith.constant 1.000000e+00 : f32
    %266 = vector.broadcast %cst_55 : f32 to vector<8x128xf32>
    %267 = arith.subf %266, %264 : vector<8x128xf32>
    %268 = arith.mulf %265, %267 : vector<8x128xf32>
    %269 = vector.extract_strided_slice %14 {offsets = [184, 0], sizes = [8, 128], strides = [1, 1]} : vector<256x128xf32> to vector<8x128xf32>
    %270 = arith.addf %268, %269 : vector<8x128xf32>
    %271 = arith.subf %270, %9 : vector<8x128xf32>
    %cst_56 = arith.constant 0.000000e+00 : f32
    %272 = vector.broadcast %cst_56 : f32 to vector<8x128xf32>
    %273 = arith.cmpf ogt, %271, %272 : vector<8x128xf32>
    %274 = arith.extui %273 : vector<8x128xi1> to vector<8x128xi32>
    %275 = arith.sitofp %274 : vector<8x128xi32> to vector<8x128xf32>
    %276 = arith.mulf %270, %6 : vector<8x128xf32>
    %cst_57 = arith.constant 1.000000e+00 : f32
    %277 = vector.broadcast %cst_57 : f32 to vector<8x128xf32>
    %278 = arith.subf %277, %275 : vector<8x128xf32>
    %279 = arith.mulf %276, %278 : vector<8x128xf32>
    %280 = vector.extract_strided_slice %14 {offsets = [192, 0], sizes = [8, 128], strides = [1, 1]} : vector<256x128xf32> to vector<8x128xf32>
    %281 = arith.addf %279, %280 : vector<8x128xf32>
    %282 = arith.subf %281, %9 : vector<8x128xf32>
    %cst_58 = arith.constant 0.000000e+00 : f32
    %283 = vector.broadcast %cst_58 : f32 to vector<8x128xf32>
    %284 = arith.cmpf ogt, %282, %283 : vector<8x128xf32>
    %285 = arith.extui %284 : vector<8x128xi1> to vector<8x128xi32>
    %286 = arith.sitofp %285 : vector<8x128xi32> to vector<8x128xf32>
    %287 = arith.mulf %281, %6 : vector<8x128xf32>
    %cst_59 = arith.constant 1.000000e+00 : f32
    %288 = vector.broadcast %cst_59 : f32 to vector<8x128xf32>
    %289 = arith.subf %288, %286 : vector<8x128xf32>
    %290 = arith.mulf %287, %289 : vector<8x128xf32>
    %291 = vector.extract_strided_slice %14 {offsets = [200, 0], sizes = [8, 128], strides = [1, 1]} : vector<256x128xf32> to vector<8x128xf32>
    %292 = arith.addf %290, %291 : vector<8x128xf32>
    %293 = arith.subf %292, %9 : vector<8x128xf32>
    %cst_60 = arith.constant 0.000000e+00 : f32
    %294 = vector.broadcast %cst_60 : f32 to vector<8x128xf32>
    %295 = arith.cmpf ogt, %293, %294 : vector<8x128xf32>
    %296 = arith.extui %295 : vector<8x128xi1> to vector<8x128xi32>
    %297 = arith.sitofp %296 : vector<8x128xi32> to vector<8x128xf32>
    %298 = arith.mulf %292, %6 : vector<8x128xf32>
    %cst_61 = arith.constant 1.000000e+00 : f32
    %299 = vector.broadcast %cst_61 : f32 to vector<8x128xf32>
    %300 = arith.subf %299, %297 : vector<8x128xf32>
    %301 = arith.mulf %298, %300 : vector<8x128xf32>
    %302 = vector.extract_strided_slice %14 {offsets = [208, 0], sizes = [8, 128], strides = [1, 1]} : vector<256x128xf32> to vector<8x128xf32>
    %303 = arith.addf %301, %302 : vector<8x128xf32>
    %304 = arith.subf %303, %9 : vector<8x128xf32>
    %cst_62 = arith.constant 0.000000e+00 : f32
    %305 = vector.broadcast %cst_62 : f32 to vector<8x128xf32>
    %306 = arith.cmpf ogt, %304, %305 : vector<8x128xf32>
    %307 = arith.extui %306 : vector<8x128xi1> to vector<8x128xi32>
    %308 = arith.sitofp %307 : vector<8x128xi32> to vector<8x128xf32>
    %309 = arith.mulf %303, %6 : vector<8x128xf32>
    %cst_63 = arith.constant 1.000000e+00 : f32
    %310 = vector.broadcast %cst_63 : f32 to vector<8x128xf32>
    %311 = arith.subf %310, %308 : vector<8x128xf32>
    %312 = arith.mulf %309, %311 : vector<8x128xf32>
    %313 = vector.extract_strided_slice %14 {offsets = [216, 0], sizes = [8, 128], strides = [1, 1]} : vector<256x128xf32> to vector<8x128xf32>
    %314 = arith.addf %312, %313 : vector<8x128xf32>
    %315 = arith.subf %314, %9 : vector<8x128xf32>
    %cst_64 = arith.constant 0.000000e+00 : f32
    %316 = vector.broadcast %cst_64 : f32 to vector<8x128xf32>
    %317 = arith.cmpf ogt, %315, %316 : vector<8x128xf32>
    %318 = arith.extui %317 : vector<8x128xi1> to vector<8x128xi32>
    %319 = arith.sitofp %318 : vector<8x128xi32> to vector<8x128xf32>
    %320 = arith.mulf %314, %6 : vector<8x128xf32>
    %cst_65 = arith.constant 1.000000e+00 : f32
    %321 = vector.broadcast %cst_65 : f32 to vector<8x128xf32>
    %322 = arith.subf %321, %319 : vector<8x128xf32>
    %323 = arith.mulf %320, %322 : vector<8x128xf32>
    %324 = vector.extract_strided_slice %14 {offsets = [224, 0], sizes = [8, 128], strides = [1, 1]} : vector<256x128xf32> to vector<8x128xf32>
    %325 = arith.addf %323, %324 : vector<8x128xf32>
    %326 = arith.subf %325, %9 : vector<8x128xf32>
    %cst_66 = arith.constant 0.000000e+00 : f32
    %327 = vector.broadcast %cst_66 : f32 to vector<8x128xf32>
    %328 = arith.cmpf ogt, %326, %327 : vector<8x128xf32>
    %329 = arith.extui %328 : vector<8x128xi1> to vector<8x128xi32>
    %330 = arith.sitofp %329 : vector<8x128xi32> to vector<8x128xf32>
    %331 = arith.mulf %325, %6 : vector<8x128xf32>
    %cst_67 = arith.constant 1.000000e+00 : f32
    %332 = vector.broadcast %cst_67 : f32 to vector<8x128xf32>
    %333 = arith.subf %332, %330 : vector<8x128xf32>
    %334 = arith.mulf %331, %333 : vector<8x128xf32>
    %335 = vector.extract_strided_slice %14 {offsets = [232, 0], sizes = [8, 128], strides = [1, 1]} : vector<256x128xf32> to vector<8x128xf32>
    %336 = arith.addf %334, %335 : vector<8x128xf32>
    %337 = arith.subf %336, %9 : vector<8x128xf32>
    %cst_68 = arith.constant 0.000000e+00 : f32
    %338 = vector.broadcast %cst_68 : f32 to vector<8x128xf32>
    %339 = arith.cmpf ogt, %337, %338 : vector<8x128xf32>
    %340 = arith.extui %339 : vector<8x128xi1> to vector<8x128xi32>
    %341 = arith.sitofp %340 : vector<8x128xi32> to vector<8x128xf32>
    %342 = arith.mulf %336, %6 : vector<8x128xf32>
    %cst_69 = arith.constant 1.000000e+00 : f32
    %343 = vector.broadcast %cst_69 : f32 to vector<8x128xf32>
    %344 = arith.subf %343, %341 : vector<8x128xf32>
    %345 = arith.mulf %342, %344 : vector<8x128xf32>
    %346 = vector.extract_strided_slice %14 {offsets = [240, 0], sizes = [8, 128], strides = [1, 1]} : vector<256x128xf32> to vector<8x128xf32>
    %347 = arith.addf %345, %346 : vector<8x128xf32>
    %348 = arith.subf %347, %9 : vector<8x128xf32>
    %cst_70 = arith.constant 0.000000e+00 : f32
    %349 = vector.broadcast %cst_70 : f32 to vector<8x128xf32>
    %350 = arith.cmpf ogt, %348, %349 : vector<8x128xf32>
    %351 = arith.extui %350 : vector<8x128xi1> to vector<8x128xi32>
    %352 = arith.sitofp %351 : vector<8x128xi32> to vector<8x128xf32>
    %353 = arith.mulf %347, %6 : vector<8x128xf32>
    %cst_71 = arith.constant 1.000000e+00 : f32
    %354 = vector.broadcast %cst_71 : f32 to vector<8x128xf32>
    %355 = arith.subf %354, %352 : vector<8x128xf32>
    %356 = arith.mulf %353, %355 : vector<8x128xf32>
    %357 = vector.extract_strided_slice %14 {offsets = [248, 0], sizes = [8, 128], strides = [1, 1]} : vector<256x128xf32> to vector<8x128xf32>
    %358 = arith.addf %356, %357 : vector<8x128xf32>
    %359 = arith.subf %358, %9 : vector<8x128xf32>
    %cst_72 = arith.constant 0.000000e+00 : f32
    %360 = vector.broadcast %cst_72 : f32 to vector<8x128xf32>
    %361 = arith.cmpf ogt, %359, %360 : vector<8x128xf32>
    %362 = arith.extui %361 : vector<8x128xi1> to vector<8x128xi32>
    %363 = arith.sitofp %362 : vector<8x128xi32> to vector<8x128xf32>
    %364 = arith.mulf %358, %6 : vector<8x128xf32>
    %cst_73 = arith.constant 1.000000e+00 : f32
    %365 = vector.broadcast %cst_73 : f32 to vector<8x128xf32>
    %366 = arith.subf %365, %363 : vector<8x128xf32>
    %367 = arith.mulf %364, %366 : vector<8x128xf32>
    %c0_74 = arith.constant 0 : index
    %c0_75 = arith.constant 0 : index
    %368 = vector.load %arg8[%c0_74, %c0_75] : memref<8x128xf32, #tpu.memory_space<vmem>>, vector<8x128xf32>
    tpu.vector_store %arg8[%c0_74, %c0_75], %367 {strides = array<i32>} : memref<8x128xf32, #tpu.memory_space<vmem>>, vector<8x128xf32>,
    %369 = tpu.concatenate %22, %33, %44, %55, %66, %77, %88, %99, %110, %121, %132, %143, %154, %165, %176, %187 in 0 : vector<8x128xf32>, vector<8x128xf32>, vector<8x128xf32>, vector<8x128xf32>, vector<8x128xf32>, vector<8x128xf32>, vector<8x128xf32>, vector<8x128xf32>, vector<8x128xf32>, vector<8x128xf32>, vector<8x128xf32>, vector<8x128xf32>, vector<8x128xf32>, vector<8x128xf32>, vector<8x128xf32>, vector<8x128xf32> -> vector<128x128xf32>
    %370 = tpu.concatenate %198, %209, %220, %231, %242, %253, %264, %275, %286, %297, %308, %319, %330, %341, %352, %363 in 0 : vector<8x128xf32>, vector<8x128xf32>, vector<8x128xf32>, vector<8x128xf32>, vector<8x128xf32>, vector<8x128xf32>, vector<8x128xf32>, vector<8x128xf32>, vector<8x128xf32>, vector<8x128xf32>, vector<8x128xf32>, vector<8x128xf32>, vector<8x128xf32>, vector<8x128xf32>, vector<8x128xf32>, vector<8x128xf32> -> vector<128x128xf32>
    %371 = tpu.concatenate %369, %370 in 0 : vector<128x128xf32>, vector<128x128xf32> -> vector<256x128xf32>
    %372 = tpu.concatenate %17, %28, %39, %50, %61, %72, %83, %94, %105, %116, %127, %138, %149, %160, %171, %182 in 0 : vector<8x128xf32>, vector<8x128xf32>, vector<8x128xf32>, vector<8x128xf32>, vector<8x128xf32>, vector<8x128xf32>, vector<8x128xf32>, vector<8x128xf32>, vector<8x128xf32>, vector<8x128xf32>, vector<8x128xf32>, vector<8x128xf32>, vector<8x128xf32>, vector<8x128xf32>, vector<8x128xf32>, vector<8x128xf32> -> vector<128x128xf32>
    %373 = tpu.concatenate %193, %204, %215, %226, %237, %248, %259, %270, %281, %292, %303, %314, %325, %336, %347, %358 in 0 : vector<8x128xf32>, vector<8x128xf32>, vector<8x128xf32>, vector<8x128xf32>, vector<8x128xf32>, vector<8x128xf32>, vector<8x128xf32>, vector<8x128xf32>, vector<8x128xf32>, vector<8x128xf32>, vector<8x128xf32>, vector<8x128xf32>, vector<8x128xf32>, vector<8x128xf32>, vector<8x128xf32>, vector<8x128xf32> -> vector<128x128xf32>
    %374 = tpu.concatenate %372, %373 in 0 : vector<128x128xf32>, vector<128x128xf32> -> vector<256x128xf32>
    %375 = arith.truncf %371 : vector<256x128xf32> to vector<256x128xbf16>
    %c0_76 = arith.constant 0 : index
    %c0_77 = arith.constant 0 : index
    %376 = vector.load %arg6[%c0_76, %c0_77] : memref<256x128xbf16, #tpu.memory_space<vmem>>, vector<256x128xbf16>
    tpu.vector_store %arg6[%c0_76, %c0_77], %375 {strides = array<i32>} : memref<256x128xbf16, #tpu.memory_space<vmem>>, vector<256x128xbf16>,
    %c0_78 = arith.constant 0 : index
    %c0_79 = arith.constant 0 : index
    %377 = vector.load %arg7[%c0_78, %c0_79] : memref<256x128xf32, #tpu.memory_space<vmem>>, vector<256x128xf32>
    tpu.vector_store %arg7[%c0_78, %c0_79], %374 {strides = array<i32>} : memref<256x128xf32, #tpu.memory_space<vmem>>, vector<256x128xf32>,
    return
  }
  func.func @transform_0(%arg0: i32, %arg1: i32) -> (i32, i32) {
    %c0_i32 = arith.constant 0 : i32
    %c0_i32_0 = arith.constant 0 : i32
    return %arg1, %c0_i32 : i32, i32
  }
  func.func @transform_1(%arg0: i32, %arg1: i32) -> (i32, i32) {
    %c0_i32 = arith.constant 0 : i32
    %c0_i32_0 = arith.constant 0 : i32
    return %c0_i32, %arg0 : i32, i32
  }
  func.func @transform_2(%arg0: i32, %arg1: i32) -> (i32, i32) {
    %c0_i32 = arith.constant 0 : i32
    %c0_i32_0 = arith.constant 0 : i32
    return %c0_i32, %arg0 : i32, i32
  }
  func.func @transform_3(%arg0: i32, %arg1: i32) -> (i32, i32) {
    %c0_i32 = arith.constant 0 : i32
    %c0_i32_0 = arith.constant 0 : i32
    return %c0_i32, %arg0 : i32, i32
  }
  func.func @transform_4(%arg0: i32, %arg1: i32) -> (i32, i32) {
    %c0_i32 = arith.constant 0 : i32
    return %arg1, %arg0 : i32, i32
  }
  func.func @transform_5(%arg0: i32, %arg1: i32) -> (i32, i32) {
    %c0_i32 = arith.constant 0 : i32
    return %arg1, %arg0 : i32, i32
  }
}

</mosaic_0001>

<bundles_post_ra>
// kernel: tpu_custom_call.1
= control target key start
LH: loop header
LB: loop body
LE: loop exit
PB: predicated region body
PF: predicated region fallthrough
CT: control target
= control target key end

     0   :  { %11 = vsyncpa [#allocation4], 0  ;;  %s2603_s0 = inlined_call_operand.hbm [shape: bf16[512,128], index: 0, kind: input, shape index: {}]   ;;  %s2604_s1 = inlined_call_operand.hbm [shape: bf16[128,128], index: 1, kind: input, shape index: {}]   ;;  %s2605_s2 = inlined_call_operand.hbm [shape: f32[3,128], index: 2, kind: input, shape index: {}]   ;;  %s2606_s3 = inlined_call_operand.vmem [shape: f32[8,128], index: 3, kind: input, shape index: {}]   ;;  %s2607_s4 = inlined_call_operand.hbm [shape: bf16[512,128], index: 4, kind: output, shape index: {0}]   ;;  %s2608_s5 = inlined_call_operand.hbm [shape: f32[512,128], index: 5, kind: output, shape index: {1}]  }
   0x1   :  { %13 = vsyncpa [#allocation4 + $0x1], 0 }
   0x2   :  { %14 = vsyncpa [#allocation7], 0 }
   0x3   :  { %15 = vsyncpa [#allocation5], 0 }
   0x4   :  { %17 = vsyncpa [#allocation5 + $0x1], 0 }
   0x5   :  { %18 = vsyncpa [#allocation11], 0 }
   0x6   :  { %20 = vsyncpa [#allocation11 + $0x1], 0  ;;  %s2017_s18 = smov 0   ;;  %s2019_s19 = smov 0  }
   0x7   :  { %s2021_s20 = smov 0   ;;  %s2023_s21 = smov 0  }
   0x8   :  { %s2025_s22 = smov 0   ;;  %s2027_s23 = smov 0  }
   0x9 LB: > { %s1348_s24 = sadd.s32 4294967295, %s1973_s23   ;;  %s1349_s25 = sadd.s32 4294967294, %s1973_s23   ;;  %s1973_s23 = sphi %s2027_s23, %s26_s23   ;;  %s1969_s22 = sphi %s2025_s22, %s2632_s22   ;;  %s1965_s21 = sphi %s2023_s21, %s2631_s21   ;;  %s1961_s20 = sphi %s2021_s20, %s2630_s20   ;;  %s1957_s19 = sphi %s2019_s19, %s2629_s19   ;;  %s1953_s18 = sphi %s2017_s18, %s2628_s18  }
   0xa   : > { %p58_p0 = scmp.ne.s32.totalorder %s1957_s19, %s1953_s18  ;;  %p2051_p1 = scmp.eq.s32.totalorder %s1348_s24, 0 }
   0xb   : > { %p2055_p2 = scmp.eq.s32.totalorder %s1348_s24, 1  ;;  %p168_p3 = scmp.eq.s32.totalorder %s1349_s25, 1 }
   0xc   : > { %s2614_s26 = scalar_select %p2051_p1, 1, 0 }
   0xd   : > { %p2061_p4 = por %p2051_p1, %p58_p0  ;;  %p1350_p5 = scmp.ge.s32.totalorder %s1973_s23, 1 }
   0xe   : > { %p2066_p6 = por %p168_p3, %p58_p0  ;;  %p203_p7 = scmp.lt.s32.totalorder %s1973_s23, 3 }
   0xf   : > { %s2616_s28 = scalar_select %p2061_p4, 1, 0 }
  0x10   : > { %s2617_s29 = scalar_select %p2066_p6, 1, 0 }
  0x11   : > { %p2071_p8 = pnand %p1350_p5, %p203_p7  ;;  %s1975_s6 = smov [#allocation6]  }
  0x12   : > { %s217_s7 = sshll.u32 %s1975_s6, 4  ;;  %s1976_s9 = smov [#allocation8]   ;;  %s2075_s7 = int_to_ptr.vmem [resolvable:$true] %s217_s7 }
  0x13   : > { %p1664_p9 = pneg %p2071_p8  ;;  %s233_s10 = sshll.u32 %s1976_s9, 4  ;;  %s2086_s10 = int_to_ptr.vmem [resolvable:$true] %s233_s10 }
  0x14   : > { %s1769_s13 = scalar_lea.hbm %s2604_s1, 1024 }
  0x15   : > { %p2082_p11 = pnand %p1664_p9, %p2051_p1  ;;  %p1770_p12 = scmp.ne.s32.totalorder %s2604_s1, %s1769_s13 }
  0x16   : > { %p1776_p5 = scmp.lt.u32.totalorder %s1769_s13, %s2604_s1 }
  0x17   : > { %p1771_p13 = pneg %p2082_p11 }
  0x19   : > { %p1772_p0 = pnand %p1771_p13, %p1770_p12 }
  0x1b   : > { %p1773_p3 = pneg %p1772_p0 }
  0x1d   : > { %p1778_p7 = pnand %p1776_p5, %p1773_p3 }
  0x1f   : > { %1781 = shalt.err (!%p1778_p7)
}
  0x20   : > { %s1782_s24 = scalar_lea.vmem %s2075_s7, 1024  ;;  %p1790_p1 = scmp.lt.s32.totalorder %s2075_s7, %s2075_s7 }
  0x21   : > { %p1783_p9 = scmp.ne.s32.totalorder %s2075_s7, %s1782_s24  ;;  %p1791_p12 = scmp.lt.s32.totalorder %s1782_s24, %s1782_s24 }
  0x23   : > { %p1785_p10 = pnand %p1783_p9, %p1771_p13  ;;  %p1792_p0 = por %p1791_p12, %p1790_p1 }
  0x25   : > { %p1786_p6 = pneg %p1785_p10 }
  0x27   : > { %p1793_p4 = pnand %p1792_p0, %p1786_p6 }
  0x29   : > { %1796 = shalt.err (!%p1793_p4)
}
  0x2a   : > { %s2612_s25 = smov 64   ;;  %s1978_s6 = smov 4  }
  0x2b   : > { %1667 = dma.hbm_to_vmem [thread:$0]  (!%p2082_p11), %s2604_s1, 1024, %s2075_s7, [#allocation7], %s2612_s25, %s2612_s25, %s1978_s6  }
  0x2c   : > { %s1797_s14 = scalar_lea.hbm %s2605_s2, 64 }
  0x2d   : > { %p1798_p1 = scmp.ne.s32.totalorder %s2605_s2, %s1797_s14  ;;  %p1804_p10 = scmp.lt.u32.totalorder %s1797_s14, %s2605_s2 }
  0x2f   : > { %p1800_p4 = pnand %p1798_p1, %p1771_p13 }
  0x31   : > { %p1801_p6 = pneg %p1800_p4 }
  0x33   : > { %p1806_p3 = pnand %p1804_p10, %p1801_p6 }
  0x35   : > { %1809 = shalt.err (!%p1806_p3)
}
  0x36   : > { %s1810_s7 = scalar_lea.vmem %s2086_s10, 64  ;;  %p1818_p12 = scmp.lt.s32.totalorder %s2086_s10, %s2086_s10 }
  0x37   : > { %p1811_p5 = scmp.ne.s32.totalorder %s2086_s10, %s1810_s7  ;;  %p1819_p0 = scmp.lt.s32.totalorder %s1810_s7, %s1810_s7 }
  0x39   : > { %p1813_p7 = pnand %p1811_p5, %p1771_p13  ;;  %p1820_p1 = por %p1819_p0, %p1818_p12 }
  0x3b   : > { %p1814_p9 = pneg %p1813_p7 }
  0x3d   : > { %p1821_p4 = pnand %p1820_p1, %p1814_p9 }
  0x3f   : > { %1824 = shalt.err (!%p1821_p4)
}
  0x40   : > { %1670 = dma.hbm_to_vmem [thread:$0]  (!%p2082_p11), %s2605_s2, 64, %s2086_s10, [#allocation7]  }
  0x41   : > { %s35_s12 = sadd.s32 1, %s1969_s22  ;;  %s45_s13 = sadd.s32 1, %s1961_s20 }
  0x42   : > { %p36_p13 = scmp.ge.s32.totalorder %s35_s12, 2  ;;  %p52_p6 = scmp.ne.s32.totalorder %s1961_s20, %s1957_s19 }
  0x43   : > { %p53_p10 = scmp.eq.s32.totalorder %s1973_s23, 0  ;;  %p1684_p3 = scmp.lt.s32.totalorder %s1973_s23, 2 }
  0x44   : > { %s2634_s12 = smov (%p36_p13, %s35_s12), 0  ;;  %p2153_p7 = por %p2055_p2, %p52_p6 }
  0x45   : > { %p54_p5 = por %p53_p10, %p52_p6  ;;  %s42_s14 = ssub.s32 %s1969_s22, %s2634_s12 }
  0x46   : > { %s2620_s8 = scalar_select %p2153_p7, 1, 0 }
  0x47   : > { %s251_s15 = sand.u32 1, %s1961_s20   ;;  %p43_p9 = scmp.eq.s32.totalorder %s42_s14, 0 }
  0x48   : > { %s1355_s10 = sshll.u32 %s251_s15, 7  ;;  %s1464_s16 = sshll.u32 %s1969_s22, 11 }
  0x49   : > { %s2162_s17 = scalar_select %p43_p9, %s1961_s20, %s45_s13  }
  0x4a   : > { %s2167_s9 = scalar_lea.hbm %s2603_s0, %s1464_s16  ;;  %s255_s27 = scalar_lea.vmem [#allocation3], %s1355_s10 }
  0x4b   : > { %s262_s11 = sshll.u32 %s255_s27, 4  ;;  %p2171_p2 = pnand %p1684_p3, %p54_p5  ;;  %s2175_s11 = int_to_ptr.vmem [resolvable:$true] %s262_s11 }
  0x4c   : > { %s2177_s13 = scalar_lea.sflag [#allocation4], %s251_s15  ;;  %s1825_s14 = scalar_lea.hbm %s2167_s9, 2048 }
  0x4d   : > { %p1826_p11 = scmp.ne.s32.totalorder %s2167_s9, %s1825_s14  ;;  %p1827_p12 = pneg %p2171_p2 }
  0x4e   : > { %s1830_s24 = scalar_lea.hbm %s2603_s0, 4096  ;;  %p1831_p4 = scmp.lt.u32.totalorder %s2167_s9, %s2603_s0 }
  0x4f   : > { %p1828_p0 = pnand %p1827_p12, %p1826_p11  ;;  %p1832_p13 = scmp.lt.u32.totalorder %s1830_s24, %s1825_s14 }
  0x50   : > { %p1834_p10 = scmp.lt.u32.totalorder %s1825_s14, %s2167_s9 }
  0x51   : > { %p1829_p1 = pneg %p1828_p0  ;;  %p1833_p6 = por %p1832_p13, %p1831_p4 }
  0x53   : > { %p1835_p3 = por %p1834_p10, %p1833_p6 }
  0x55   : > { %p1836_p5 = pnand %p1835_p3, %p1829_p1 }
  0x57   : > { %1839 = shalt.err (!%p1836_p5)
}
  0x58   : > { %s1840_s15 = scalar_lea.vmem %s2175_s11, 2048  ;;  %s1979_s10 = smov [#allocation3]  }
  0x59   : > { %p1841_p9 = scmp.ne.s32.totalorder %s2175_s11, %s1840_s15  ;;  %s1845_s16 = sshll.u32 %s1979_s10, 4  ;;  %s1846_s16 = int_to_ptr.vmem [resolvable:$false] %s1845_s16 }
  0x5a   : > { %s1847_s7 = scalar_lea.vmem %s1846_s16, 4096  ;;  %p1848_p7 = scmp.lt.s32.totalorder %s2175_s11, %s1846_s16 }
  0x5b   : > { %p1843_p11 = pnand %p1841_p9, %p1827_p12  ;;  %p1849_p4 = scmp.lt.s32.totalorder %s1847_s7, %s1840_s15 }
  0x5d   : > { %p1844_p0 = pneg %p1843_p11  ;;  %p1850_p13 = por %p1849_p4, %p1848_p7 }
  0x5f   : > { %p1851_p6 = pnand %p1850_p13, %p1844_p0 }
  0x61   : > { %1854 = shalt.err (!%p1851_p6)
}
  0x62   : > { %s2622_s14 = smov 64   ;;  %274 = sbr.rel (%p2071_p8) target bundleno = 718 (0x2ce), region = 36 }
  0x63   : > { %1674 = dma.hbm_to_vmem [thread:$0]  (!%p2171_p2), %s2167_s9, 2048, %s2175_s11, %s2177_s13, %s2622_s14, %s2622_s14, %s1978_s6  }
  0x64   : > { %s2211_s24 = sand.u32 (!%p2071_p8), 1, %s1957_s19   ;;  %p2623_p7 = scmp.ne.s32.totalorder (!%p2071_p8), %s2616_s28, 0 }
  0x65   : > { %s1359_s27 = sshll.u32 (!%p2071_p8), %s2211_s24, 7  ;;  %s277_s15 = scalar_lea.sflag (!%p2071_p8), [#allocation4], %s2211_s24 }
  0x66   : > { %s2215_s10 = scalar_lea.vmem (!%p2071_p8), [#allocation3], %s1359_s27 }
  0x69   : > { %1936 = dma.done.wait (%p2623_p7), %s277_s15, 2048  }
  0x6a   : > { %1938 = vsyncadd (%p2623_p7), %s277_s15, 4294965248  ;;  %p2624_p2 = scmp.ne.s32.totalorder %s2614_s26, 0 }
  0x6c   : > { %1940 = dma.done.wait (%p2624_p2), [#allocation7], 1088  }
  0x6d   : > { %1942 = vsyncadd (%p2624_p2), [#allocation7], 4294966208  ;;  %s1363_s30 = sshll.u32 %s2211_s24, 8  ;;  %s2226_s25 = scalar_lea.vmem [#allocation9], %s1359_s27 }
  0x6e   : > { %s2228_s6 = scalar_lea.vmem [#allocation10], %s1363_s30  ;;  %p1364_p8 = scmp.ne.s32.totalorder %s1965_s21, 0 }
  0x6f   : > { %v336_v0 = vld [vmem:[%s2606_s3] sm:$0xff] (!%p1364_p8) }
  0x70   : > { %335 = sbr.rel (%p1364_p8) target bundleno = 119 (0x77), region = 52  ;;  %337 = vst [vmem:[#allocation2] sm:$0xff] (!%p1364_p8), %v336_v0 }
  0x77 PF: > { %v1745_v1 = vld [vmem:[#allocation6] sm:$0xff]   ;;  %v1746_v2 = vld [vmem:[#allocation6 + $0x8] sm:$0xff]   ;;  %v1747_v3 = vld [vmem:[#allocation6 + $0x10] sm:$0xff]   ;;  %v1980_v37 = vmov 0.0   ;;  %s1498_s26 = sshll.u32 %s1965_s21, 12  ;;  %s1193_s28 = sshll.u32 %s2228_s6, 4  ;;  %s2512_s28 = int_to_ptr.vmem [resolvable:$true] %s1193_s28 }
  0x78   : > { %1586 = vmatprep.subr.bf16.mxu0 %v1745_v1  ;;  %1634 = vmatprep.subr.bf16.mxu1 %v1745_v1  ;;  %v1748_v4 = vld [vmem:[#allocation6 + $0x18] sm:$0xff]   ;;  %v1753_v5 = vld [vmem:[%s2215_s10] sm:$0xff]   ;;  %v1750_v7 = vld [vmem:[#allocation6 + $0x28] sm:$0xff]   ;;  %s2510_s7 = scalar_lea.hbm %s2608_s5, %s1498_s26  ;;  %s1497_s14 = sshll.u32 %s1965_s21, 11 }
  0x79   : > { %1587 = vmatpush3.bf16.msra.mxu0 %v1745_v1  ;;  %1642 = vmatpush3.bf16.msra.mxu1 %v1745_v1  ;;  %v1749_v6 = vld [vmem:[#allocation6 + $0x20] sm:$0xff]   ;;  %v1751_v9 = vld [vmem:[#allocation6 + $0x30] sm:$0xff]   ;;  %v1752_v10 = vld [vmem:[#allocation6 + $0x38] sm:$0xff]   ;;  %s1176_s27 = sshll.u32 %s2226_s25, 4  ;;  %s1162_s15 = scalar_lea.sflag [#allocation11], %s2211_s24  ;;  %s2552_s27 = int_to_ptr.vmem [resolvable:$true] %s1176_s27 }
  0x7a   : > { %1588 = vmatprep.subr.bf16.mxu0 %v1746_v2  ;;  %1635 = vmatprep.subr.bf16.mxu1 %v1746_v2  ;;  %v1761_v8 = vld [vmem:[%s2215_s10 + $0x40] sm:$0xff]   ;;  %v1754_v11 = vld [vmem:[%s2215_s10 + $0x8] sm:$0xff]   ;;  %v1755_v13 = vld [vmem:[%s2215_s10 + $0x10] sm:$0xff]   ;;  %p2625_p1 = scmp.ne.s32.totalorder %s2620_s8, 0  ;;  %s1981_s30 = smov [#allocation10]  }
  0x7b   : > { %1602 = vmatprep.mubr.bf16.mxu0 %v1753_v5  ;;  %1618 = vmatprep.mubr.bf16.mxu1 %v1761_v8  ;;  %v1762_v12 = vld [vmem:[%s2215_s10 + $0x48] sm:$0xff]   ;;  %v1763_v14 = vld [vmem:[%s2215_s10 + $0x50] sm:$0xff]   ;;  %v1756_v15 = vld [vmem:[%s2215_s10 + $0x18] sm:$0xff]   ;;  %s1859_s9 = sshll.u32 %s1981_s30, 4  ;;  %s1860_s9 = int_to_ptr.vmem [resolvable:$false] %s1859_s9 }
  0x7c   : > { %v1764_v16 = vld [vmem:[%s2215_s10 + $0x58] sm:$0xff]   ;;  %v1757_v17 = vld [vmem:[%s2215_s10 + $0x20] sm:$0xff]   ;;  %v1758_v18 = vld [vmem:[%s2215_s10 + $0x28] sm:$0xff]   ;;  %s1861_s11 = scalar_lea.vmem %s1860_s9, 8192  ;;  %p1862_p5 = scmp.lt.s32.totalorder %s2512_s28, %s1860_s9 }
  0x7d   : > { %1589 = vmatpush3.bf16.msra.mxu0 %v1746_v2  ;;  %1643 = vmatpush3.bf16.msra.mxu1 %v1746_v2  ;;  %v1759_v19 = vld [vmem:[%s2215_s10 + $0x30] sm:$0xff]   ;;  %v1760_v20 = vld [vmem:[%s2215_s10 + $0x38] sm:$0xff]   ;;  %v1765_v21 = vld [vmem:[%s2215_s10 + $0x60] sm:$0xff]  }
  0x7e   : > { %1590 = vmatprep.subr.bf16.mxu0 %v1747_v3  ;;  %1636 = vmatprep.subr.bf16.mxu1 %v1747_v3  ;;  %v1766_v22 = vld [vmem:[%s2215_s10 + $0x68] sm:$0xff]   ;;  %v1767_v23 = vld [vmem:[%s2215_s10 + $0x70] sm:$0xff]   ;;  %v1768_v24 = vld [vmem:[%s2215_s10 + $0x78] sm:$0xff]   ;;  %s1855_s10 = scalar_lea.vmem %s2512_s28, 4096 }
  0x7f   : > { %v2250_v25 = vld [vmem:[#allocation8] ss:$0 sm:$0xff]  ;;  %v706_v28 = vld [vmem:[#allocation2] sm:$0xff]  ;;  %v2253_v31 = vld [vmem:[#allocation8 + $0x2] ss:$0 sm:$0xff]  ;;  %p1856_p12 = scmp.ne.s32.totalorder %s2512_s28, %s1855_s10  ;;  %p1863_p9 = scmp.lt.s32.totalorder %s1861_s11, %s1855_s10 }
  0x80   : > { %v2257_v35 = vld [vmem:[#allocation8 + $0x1] ss:$0 sm:$0xff] }
  0x81   : > { %1591 = vmatpush3.bf16.msra.mxu0 %v1747_v3  ;;  %1644 = vmatpush3.bf16.msra.mxu1 %v1747_v3  ;;  %p1857_p10 = pnand %p1856_p12, %p2625_p1  ;;  %p1864_p11 = por %p1863_p9, %p1862_p5 }
  0x82   : > { %1592 = vmatprep.subr.bf16.mxu0 %v1748_v4  ;;  %1637 = vmatprep.subr.bf16.mxu1 %v1748_v4 }
  0x83   : > { %p1858_p3 = pneg %p1857_p10 }
  0x85   : > { %1593 = vmatpush3.bf16.msra.mxu0 %v1748_v4  ;;  %1645 = vmatpush3.bf16.msra.mxu1 %v1748_v4  ;;  %p1865_p0 = pnand %p1864_p11, %p1858_p3 }
  0x86   : > { %1594 = vmatprep.subr.bf16.mxu0 %v1749_v6  ;;  %1638 = vmatprep.subr.bf16.mxu1 %v1749_v6 }
  0x89   : > { %1595 = vmatpush3.bf16.msra.mxu0 %v1749_v6  ;;  %1646 = vmatpush3.bf16.msra.mxu1 %v1749_v6 }
  0x8a   : > { %1596 = vmatprep.subr.bf16.mxu0 %v1750_v7  ;;  %1639 = vmatprep.subr.bf16.mxu1 %v1750_v7 }
  0x8d   : > { %1597 = vmatpush3.bf16.msra.mxu0 %v1750_v7  ;;  %1647 = vmatpush3.bf16.msra.mxu1 %v1750_v7 }
  0x8e   : > { %1598 = vmatprep.subr.bf16.mxu0 %v1751_v9  ;;  %1640 = vmatprep.subr.bf16.mxu1 %v1751_v9 }
  0x91   : > { %1599 = vmatpush3.bf16.msra.mxu0 %v1751_v9  ;;  %1648 = vmatpush3.bf16.msra.mxu1 %v1751_v9 }
  0x92   : > { %1600 = vmatprep.subr.bf16.mxu0 %v1752_v10  ;;  %1641 = vmatprep.subr.bf16.mxu1 %v1752_v10 }
  0x95   : > { %1601 = vmatpush3.bf16.msra.mxu0 %v1752_v10  ;;  %1649 = vmatpush3.bf16.msra.mxu1 %v1752_v10 }
  0x98   : > { %1603 = vmatmul.mubr.bf16.vlgmr.msra.gmra.mrb[0].mxu0 %v1754_v11  ;;  %1619 = vmatmul.mubr.bf16.vlgmr.msra.gmra.mrb[0].mxu1 %v1762_v12 }
  0x99   : > { %1606 = vmatprep.mubr.bf16.mxu0 %v1755_v13  ;;  %1622 = vmatprep.mubr.bf16.mxu1 %v1763_v14 }
  0xa0   : > { %1607 = vmatmul.mubr.bf16.gmra.mrb[4].mxu0 %v1756_v15  ;;  %1623 = vmatmul.mubr.bf16.gmra.mrb[4].mxu1 %v1764_v16 }
  0xa1   : > { %1610 = vmatprep.mubr.bf16.mxu0 %v1757_v17  ;;  %1626 = vmatprep.mubr.bf16.mxu1 %v1765_v21 }
  0xa8   : > { %1611 = vmatmul.mubr.bf16.gmra.mrb[8].mxu0 %v1758_v18  ;;  %1627 = vmatmul.mubr.bf16.gmra.mrb[8].mxu1 %v1766_v22 }
  0xa9   : > { %1614 = vmatprep.mubr.bf16.mxu0 %v1759_v19  ;;  %1630 = vmatprep.mubr.bf16.mxu1 %v1767_v23 }
  0xb0   : > { %1615 = vmatmul.mubr.bf16.gmra.mrb[12].mxu0 %v1760_v20  ;;  %1631 = vmatmul.mubr.bf16.gmra.mrb[12].mxu1 %v1768_v24 }
 0x16b   : > { %v1604_v26 = vpop.f32.mrb[0].mxu0  ;;  %v2274_v51 = vpop.f32.mrb[0].mxu1 }
 0x16c   : > { %v579_v27 = vpop.f32.mrb[1].mxu0  ;;  %v2279_v54 = vpop.f32.mrb[1].mxu1  ;;  %v588_v58 = vadd.f32 %v1604_v26, %v2250_v25 }
 0x16d   : > { %v580_v29 = vadd.f32 %v2250_v25, %v579_v27  ;;  %v1605_v30 = vpop.f32.mrb[2].mxu0  ;;  %v2296_v5 = vpop.f32.mrb[2].mxu1 }
 0x16e   : > { %v582_v32 = vpop.f32.mrb[3].mxu0  ;;  %v591_v6 = vadd.f32 %v1605_v30, %v2250_v25  ;;  %v2299_v8 = vpop.f32.mrb[3].mxu1 }
 0x16f   : > { %v707_v33 = vadd.f32 %v706_v28, %v580_v29  ;;  %v583_v45 = vadd.f32 %v2250_v25, %v582_v32 }
 0x171   : > { %v708_v34 = vsub.f32 %v707_v33, %v2253_v31  ;;  %1124 = vst [vmem:[%s2228_s6] sm:$0xff] %v707_v33  ;;  %v712_v40 = vmul.f32 %v2257_v35, %v707_v33 }
 0x173   : > { %vm709_vm0 = vcmp.gt.f32.partialorder %v708_v34, 0.0  ;;  %v2259_v36 = vpop.f32.mrb[4].mxu0  ;;  %v2314_v27 = vpop.f32.mrb[4].mxu1 }
 0x174   : > { %v1392_v38 = vsel %vm709_vm0, 1.0, %v1980_v37  ;;  %v595_v39 = vpop.f32.mrb[5].mxu0  ;;  %v2317_v29 = vpop.f32.mrb[5].mxu1  ;;  %v604_v34 = vadd.f32 %v2259_v36, %v2250_v25 }
 0x175   : > { %v713_v41 = vsub.f32 1.0, %v1392_v38  ;;  %v2263_v42 = vpop.f32.mrb[6].mxu0  ;;  %v596_v12 = vadd.f32 %v2250_v25, %v595_v39 }
 0x176   : > { %v598_v43 = vpop.f32.mrb[7].mxu0 }
 0x177   : > { %v714_v44 = vmul.f32 %v713_v41, %v712_v40  ;;  %v599_v22 = vadd.f32 %v2250_v25, %v598_v43 }
 0x179   : > { %v715_v46 = vadd.f32 %v714_v44, %v583_v45  ;;  %v2327_v45 = vpop.f32.mrb[6].mxu1 }
 0x17b   : > { %v716_v47 = vsub.f32 %v715_v46, %v2253_v31  ;;  %1125 = vst [vmem:[%s2228_s6 + $0x8] sm:$0xff] %v715_v46  ;;  %v2268_v48 = vpop.f32.mrb[8].mxu0  ;;  %v720_v55 = vmul.f32 %v2257_v35, %v715_v46  ;;  %v607_v46 = vadd.f32 %v2263_v42, %v2250_v25 }
 0x17c   : > { %v2270_v49 = vpop.f32.mrb[9].mxu0 }
 0x17d   : > { %vm717_vm1 = vcmp.gt.f32.partialorder %v716_v47, 0.0  ;;  %v2272_v50 = vpop.f32.mrb[10].mxu0  ;;  %v2331_v47 = vpop.f32.mrb[7].mxu1 }
 0x17e   : > { %v1393_v52 = vsel %vm717_vm1, 1.0, %v1980_v37  ;;  %v2277_v53 = vpop.f32.mrb[11].mxu0 }
 0x17f   : > { %v721_v56 = vsub.f32 1.0, %v1393_v52  ;;  %v1500_v57 = vpack.c.bf16 %v1393_v52, %v1392_v38 }
 0x181   : > { %v722_v59 = vmul.f32 %v721_v56, %v720_v55  ;;  %1501 = vst [vmem:[%s2226_s25] sm:$0xff] %v1500_v57   ;;  %v612_v57 = vadd.f32 %v2250_v25, %v2270_v49  ;;  %v615_v49 = vadd.f32 %v2250_v25, %v2277_v53 }
 0x183   : > { %v723_v60 = vadd.f32 %v722_v59, %v588_v58  ;;  %v2284_v61 = vpop.f32.mrb[12].mxu0 }
 0x184   : > { %v2286_v62 = vpop.f32.mrb[13].mxu0 }
 0x185   : > { %v724_v63 = vsub.f32 %v723_v60, %v2253_v31  ;;  %1126 = vst [vmem:[%s2228_s6 + $0x10] sm:$0xff] %v723_v60  ;;  %v2290_v0 = vpop.f32.mrb[14].mxu0  ;;  %v728_v3 = vmul.f32 %v2257_v35, %v723_v60 }
 0x186   : > { %v2292_v1 = vpop.f32.mrb[15].mxu0 }
 0x187   : > { %vm725_vm2 = vcmp.gt.f32.partialorder %v724_v63, 0.0 }
 0x188   : > { %v1394_v2 = vsel %vm725_vm2, 1.0, %v1980_v37 }
 0x189   : > { %v729_v4 = vsub.f32 1.0, %v1394_v2 }
 0x18b   : > { %v730_v7 = vmul.f32 %v729_v4, %v728_v3 }
 0x18d   : > { %v731_v9 = vadd.f32 %v730_v7, %v591_v6 }
 0x18f   : > { %1127 = vst [vmem:[%s2228_s6 + $0x18] sm:$0xff] %v731_v9  ;;  %v732_v10 = vsub.f32 %v731_v9, %v2253_v31  ;;  %v736_v13 = vmul.f32 %v2257_v35, %v731_v9 }
 0x191   : > { %vm733_vm3 = vcmp.gt.f32.partialorder %v732_v10, 0.0 }
 0x192   : > { %v1395_v11 = vsel %vm733_vm3, 1.0, %v1980_v37 }
 0x193   : > { %v737_v14 = vsub.f32 1.0, %v1395_v11  ;;  %v1503_v15 = vpack.c.bf16 %v1395_v11, %v1394_v2 }
 0x195   : > { %v738_v16 = vmul.f32 %v737_v14, %v736_v13  ;;  %1547 = vst [vmem:[%s2226_s25 + $0x8] sm:$0xff] %v1503_v15   ;;  %v620_v15 = vadd.f32 %v2268_v48, %v2250_v25  ;;  %v623_v48 = vadd.f32 %v2272_v50, %v2250_v25 }
 0x197   : > { %v739_v17 = vadd.f32 %v738_v16, %v596_v12 }
 0x199   : > { %v740_v18 = vsub.f32 %v739_v17, %v2253_v31  ;;  %1128 = vst [vmem:[%s2228_s6 + $0x20] sm:$0xff] %v739_v17  ;;  %v744_v20 = vmul.f32 %v2257_v35, %v739_v17 }
 0x19b   : > { %vm741_vm4 = vcmp.gt.f32.partialorder %v740_v18, 0.0 }
 0x19c   : > { %v1396_v19 = vsel %vm741_vm4, 1.0, %v1980_v37 }
 0x19d   : > { %v745_v21 = vsub.f32 1.0, %v1396_v19 }
 0x19f   : > { %v746_v23 = vmul.f32 %v745_v21, %v744_v20 }
 0x1a1   : > { %v747_v24 = vadd.f32 %v746_v23, %v599_v22 }
 0x1a3   : > { %v748_v26 = vsub.f32 %v747_v24, %v2253_v31  ;;  %1129 = vst [vmem:[%s2228_s6 + $0x28] sm:$0xff] %v747_v24  ;;  %v752_v30 = vmul.f32 %v2257_v35, %v747_v24 }
 0x1a5   : > { %vm749_vm5 = vcmp.gt.f32.partialorder %v748_v26, 0.0 }
 0x1a6   : > { %v1397_v28 = vsel %vm749_vm5, 1.0, %v1980_v37 }
 0x1a7   : > { %v753_v32 = vsub.f32 1.0, %v1397_v28  ;;  %v1506_v33 = vpack.c.bf16 %v1397_v28, %v1396_v19  ;;  %v2356_v19 = vpop.f32.mrb[8].mxu1 }
 0x1a8   : > { %v2359_v22 = vpop.f32.mrb[9].mxu1 }
 0x1a9   : > { %v754_v38 = vmul.f32 %v753_v32, %v752_v30  ;;  %1548 = vst [vmem:[%s2226_s25 + $0x10] sm:$0xff] %v1506_v33   ;;  %v2361_v23 = vpop.f32.mrb[10].mxu1  ;;  %v628_v33 = vadd.f32 %v2250_v25, %v2286_v62  ;;  %v631_v62 = vadd.f32 %v2250_v25, %v2292_v1 }
 0x1aa   : > { %v2365_v26 = vpop.f32.mrb[11].mxu1 }
 0x1ab   : > { %v755_v39 = vadd.f32 %v754_v38, %v604_v34 }
 0x1ad   : > { %1130 = vst [vmem:[%s2228_s6 + $0x30] sm:$0xff] %v755_v39  ;;  %v756_v40 = vsub.f32 %v755_v39, %v2253_v31  ;;  %v760_v43 = vmul.f32 %v2257_v35, %v755_v39 }
 0x1af   : > { %vm757_vm6 = vcmp.gt.f32.partialorder %v756_v40, 0.0 }
 0x1b0   : > { %v1398_v41 = vsel %vm757_vm6, 1.0, %v1980_v37 }
 0x1b1   : > { %v761_v44 = vsub.f32 1.0, %v1398_v41 }
 0x1b3   : > { %v762_v36 = vmul.f32 %v761_v44, %v760_v43 }
 0x1b5   : > { %v763_v52 = vadd.f32 %v762_v36, %v607_v46 }
 0x1b7   : > { %v764_v55 = vsub.f32 %v763_v52, %v2253_v31  ;;  %1131 = vst [vmem:[%s2228_s6 + $0x38] sm:$0xff] %v763_v52  ;;  %v768_v58 = vmul.f32 %v2257_v35, %v763_v52 }
 0x1b9   : > { %vm765_vm7 = vcmp.gt.f32.partialorder %v764_v55, 0.0 }
 0x1ba   : > { %v1399_v56 = vsel %vm765_vm7, 1.0, %v1980_v37 }
 0x1bb   : > { %v769_v59 = vsub.f32 1.0, %v1399_v56  ;;  %v1509_v60 = vpack.c.bf16 %v1399_v56, %v1398_v41 }
 0x1bd   : > { %v770_v42 = vmul.f32 %v769_v59, %v768_v58  ;;  %1549 = vst [vmem:[%s2226_s25 + $0x18] sm:$0xff] %v1509_v60   ;;  %v636_v60 = vadd.f32 %v2284_v61, %v2250_v25  ;;  %v639_v61 = vadd.f32 %v2290_v0, %v2250_v25 }
 0x1bf   : > { %v771_v63 = vadd.f32 %v770_v42, %v612_v57 }
 0x1c1   : > { %v772_v2 = vsub.f32 %v771_v63, %v2253_v31  ;;  %1132 = vst [vmem:[%s2228_s6 + $0x40] sm:$0xff] %v771_v63  ;;  %v776_v4 = vmul.f32 %v2257_v35, %v771_v63 }
 0x1c3   : > { %vm773_vm8 = vcmp.gt.f32.partialorder %v772_v2, 0.0 }
 0x1c4   : > { %v1400_v3 = vsel %vm773_vm8, 1.0, %v1980_v37 }
 0x1c5   : > { %v777_v6 = vsub.f32 1.0, %v1400_v3 }
 0x1c7   : > { %v778_v7 = vmul.f32 %v777_v6, %v776_v4 }
 0x1c9   : > { %v779_v9 = vadd.f32 %v778_v7, %v615_v49 }
 0x1cb   : > { %v780_v10 = vsub.f32 %v779_v9, %v2253_v31  ;;  %1133 = vst [vmem:[%s2228_s6 + $0x48] sm:$0xff] %v779_v9  ;;  %v784_v12 = vmul.f32 %v2257_v35, %v779_v9 }
 0x1cd   : > { %vm781_vm9 = vcmp.gt.f32.partialorder %v780_v10, 0.0 }
 0x1ce   : > { %v1401_v11 = vsel %vm781_vm9, 1.0, %v1980_v37 }
 0x1cf   : > { %v785_v13 = vsub.f32 1.0, %v1401_v11  ;;  %v1512_v14 = vpack.c.bf16 %v1401_v11, %v1400_v3  ;;  %v2390_v3 = vpop.f32.mrb[12].mxu1 }
 0x1d0   : > { %v2393_v49 = vpop.f32.mrb[13].mxu1 }
 0x1d1   : > { %v786_v16 = vmul.f32 %v785_v13, %v784_v12  ;;  %1550 = vst [vmem:[%s2226_s25 + $0x20] sm:$0xff] %v1512_v14   ;;  %v2395_v7 = vpop.f32.mrb[14].mxu1  ;;  %v644_v14 = vadd.f32 %v2250_v25, %v2279_v54  ;;  %v647_v54 = vadd.f32 %v2250_v25, %v2299_v8 }
 0x1d2   : > { %v2399_v10 = vpop.f32.mrb[15].mxu1 }
 0x1d3   : > { %v787_v17 = vadd.f32 %v786_v16, %v620_v15 }
 0x1d5   : > { %1134 = vst [vmem:[%s2228_s6 + $0x50] sm:$0xff] %v787_v17  ;;  %v788_v53 = vsub.f32 %v787_v17, %v2253_v31  ;;  %v792_v20 = vmul.f32 %v2257_v35, %v787_v17 }
 0x1d7   : > { %vm789_vm10 = vcmp.gt.f32.partialorder %v788_v53, 0.0 }
 0x1d8   : > { %v1402_v18 = vsel %vm789_vm10, 1.0, %v1980_v37 }
 0x1d9   : > { %v793_v21 = vsub.f32 1.0, %v1402_v18 }
 0x1db   : > { %v794_v24 = vmul.f32 %v793_v21, %v792_v20 }
 0x1dd   : > { %v795_v28 = vadd.f32 %v794_v24, %v623_v48 }
 0x1df   : > { %v796_v30 = vsub.f32 %v795_v28, %v2253_v31  ;;  %1135 = vst [vmem:[%s2228_s6 + $0x58] sm:$0xff] %v795_v28  ;;  %v800_v34 = vmul.f32 %v2257_v35, %v795_v28 }
 0x1e1   : > { %vm797_vm11 = vcmp.gt.f32.partialorder %v796_v30, 0.0 }
 0x1e2   : > { %v1403_v32 = vsel %vm797_vm11, 1.0, %v1980_v37 }
 0x1e3   : > { %v801_v38 = vsub.f32 1.0, %v1403_v32  ;;  %v1515_v39 = vpack.c.bf16 %v1403_v32, %v1402_v18 }
 0x1e5   : > { %v802_v50 = vmul.f32 %v801_v38, %v800_v34  ;;  %1551 = vst [vmem:[%s2226_s25 + $0x28] sm:$0xff] %v1515_v39   ;;  %v652_v39 = vadd.f32 %v2274_v51, %v2250_v25 }
 0x1e7   : > { %v803_v40 = vadd.f32 %v802_v50, %v628_v33 }
 0x1e9   : > { %v804_v41 = vsub.f32 %v803_v40, %v2253_v31  ;;  %1136 = vst [vmem:[%s2228_s6 + $0x60] sm:$0xff] %v803_v40  ;;  %v808_v44 = vmul.f32 %v2257_v35, %v803_v40 }
 0x1eb   : > { %vm805_vm12 = vcmp.gt.f32.partialorder %v804_v41, 0.0 }
 0x1ec   : > { %v1404_v43 = vsel %vm805_vm12, 1.0, %v1980_v37 }
 0x1ed   : > { %v809_v46 = vsub.f32 1.0, %v1404_v43 }
 0x1ef   : > { %v810_v36 = vmul.f32 %v809_v46, %v808_v44  ;;  %v655_v46 = vadd.f32 %v2296_v5, %v2250_v25 }
 0x1f1   : > { %v811_v52 = vadd.f32 %v810_v36, %v631_v62 }
 0x1f3   : > { %v812_v55 = vsub.f32 %v811_v52, %v2253_v31  ;;  %1137 = vst [vmem:[%s2228_s6 + $0x68] sm:$0xff] %v811_v52  ;;  %v816_v57 = vmul.f32 %v2257_v35, %v811_v52 }
 0x1f5   : > { %vm813_vm13 = vcmp.gt.f32.partialorder %v812_v55, 0.0  ;;  %v660_v55 = vadd.f32 %v2250_v25, %v2317_v29  ;;  %v663_v29 = vadd.f32 %v2250_v25, %v2331_v47 }
 0x1f6   : > { %v1405_v56 = vsel %vm813_vm13, 1.0, %v1980_v37 }
 0x1f7   : > { %v817_v58 = vsub.f32 1.0, %v1405_v56  ;;  %v1518_v59 = vpack.c.bf16 %v1405_v56, %v1404_v43 }
 0x1f9   : > { %v818_v42 = vmul.f32 %v817_v58, %v816_v57  ;;  %1552 = vst [vmem:[%s2226_s25 + $0x30] sm:$0xff] %v1518_v59  }
 0x1fb   : > { %v819_v63 = vadd.f32 %v818_v42, %v636_v60 }
 0x1fd   : > { %1138 = vst [vmem:[%s2228_s6 + $0x70] sm:$0xff] %v819_v63  ;;  %v820_v1 = vsub.f32 %v819_v63, %v2253_v31  ;;  %v824_v4 = vmul.f32 %v2257_v35, %v819_v63 }
 0x1ff   : > { %vm821_vm14 = vcmp.gt.f32.partialorder %v820_v1, 0.0 }
 0x200   : > { %v1406_v2 = vsel %vm821_vm14, 1.0, %v1980_v37 }
 0x201   : > { %v825_v6 = vsub.f32 1.0, %v1406_v2 }
 0x203   : > { %v826_v9 = vmul.f32 %v825_v6, %v824_v4 }
 0x205   : > { %v827_v11 = vadd.f32 %v826_v9, %v639_v61 }
 0x207   : > { %v828_v12 = vsub.f32 %v827_v11, %v2253_v31  ;;  %1139 = vst [vmem:[%s2228_s6 + $0x78] sm:$0xff] %v827_v11  ;;  %v832_v15 = vmul.f32 %v2257_v35, %v827_v11 }
 0x209   : > { %vm829_vm15 = vcmp.gt.f32.partialorder %v828_v12, 0.0 }
 0x20a   : > { %v1407_v13 = vsel %vm829_vm15, 1.0, %v1980_v37 }
 0x20b   : > { %v833_v16 = vsub.f32 1.0, %v1407_v13  ;;  %v1521_v17 = vpack.c.bf16 %v1407_v13, %v1406_v2  ;;  %v668_v13 = vadd.f32 %v2314_v27, %v2250_v25 }
 0x20d   : > { %v834_v0 = vmul.f32 %v833_v16, %v832_v15  ;;  %1553 = vst [vmem:[%s2226_s25 + $0x38] sm:$0xff] %v1521_v17  }
 0x20f   : > { %v835_v53 = vadd.f32 %v834_v0, %v644_v14 }
 0x211   : > { %v836_v18 = vsub.f32 %v835_v53, %v2253_v31  ;;  %1140 = vst [vmem:[%s2228_s6 + $0x80] sm:$0xff] %v835_v53  ;;  %v840_v21 = vmul.f32 %v2257_v35, %v835_v53  ;;  %v671_v53 = vadd.f32 %v2327_v45, %v2250_v25 }
 0x213   : > { %vm837_vm0 = vcmp.gt.f32.partialorder %v836_v18, 0.0 }
 0x214   : > { %v1408_v20 = vsel %vm837_vm0, 1.0, %v1980_v37 }
 0x215   : > { %v841_v48 = vsub.f32 1.0, %v1408_v20 }
 0x217   : > { %v842_v24 = vmul.f32 %v841_v48, %v840_v21  ;;  %v676_v48 = vadd.f32 %v2250_v25, %v2359_v22  ;;  %v679_v22 = vadd.f32 %v2250_v25, %v2365_v26 }
 0x219   : > { %v843_v28 = vadd.f32 %v842_v24, %v647_v54 }
 0x21b   : > { %v844_v30 = vsub.f32 %v843_v28, %v2253_v31  ;;  %1141 = vst [vmem:[%s2228_s6 + $0x88] sm:$0xff] %v843_v28  ;;  %v848_v33 = vmul.f32 %v2257_v35, %v843_v28 }
 0x21d   : > { %vm845_vm1 = vcmp.gt.f32.partialorder %v844_v30, 0.0 }
 0x21e   : > { %v1409_v32 = vsel %vm845_vm1, 1.0, %v1980_v37 }
 0x21f   : > { %v849_v34 = vsub.f32 1.0, %v1409_v32  ;;  %v1524_v38 = vpack.c.bf16 %v1409_v32, %v1408_v20 }
 0x221   : > { %v850_v50 = vmul.f32 %v849_v34, %v848_v33  ;;  %1554 = vst [vmem:[%s2226_s25 + $0x40] sm:$0xff] %v1524_v38  }
 0x223   : > { %v851_v40 = vadd.f32 %v850_v50, %v652_v39 }
 0x225   : > { %1142 = vst [vmem:[%s2228_s6 + $0x90] sm:$0xff] %v851_v40  ;;  %v852_v8 = vsub.f32 %v851_v40, %v2253_v31  ;;  %v856_v43 = vmul.f32 %v2257_v35, %v851_v40 }
 0x227   : > { %vm853_vm2 = vcmp.gt.f32.partialorder %v852_v8, 0.0 }
 0x228   : > { %v1410_v41 = vsel %vm853_vm2, 1.0, %v1980_v37 }
 0x229   : > { %v857_v44 = vsub.f32 1.0, %v1410_v41 }
 0x22b   : > { %v858_v62 = vmul.f32 %v857_v44, %v856_v43 }
 0x22d   : > { %v859_v36 = vadd.f32 %v858_v62, %v655_v46  ;;  %v684_v46 = vadd.f32 %v2356_v19, %v2250_v25 }
 0x22f   : > { %v860_v51 = vsub.f32 %v859_v36, %v2253_v31  ;;  %1143 = vst [vmem:[%s2228_s6 + $0x98] sm:$0xff] %v859_v36  ;;  %v864_v56 = vmul.f32 %v2257_v35, %v859_v36 }
 0x231   : > { %vm861_vm3 = vcmp.gt.f32.partialorder %v860_v51, 0.0 }
 0x232   : > { %v1411_v52 = vsel %vm861_vm3, 1.0, %v1980_v37 }
 0x233   : > { %v865_v57 = vsub.f32 1.0, %v1411_v52  ;;  %v1527_v58 = vpack.c.bf16 %v1411_v52, %v1410_v41 }
 0x235   : > { %v866_v59 = vmul.f32 %v865_v57, %v864_v56  ;;  %1555 = vst [vmem:[%s2226_s25 + $0x48] sm:$0xff] %v1527_v58   ;;  %v687_v56 = vadd.f32 %v2361_v23, %v2250_v25 }
 0x237   : > { %v867_v60 = vadd.f32 %v866_v59, %v660_v55 }
 0x239   : > { %v868_v5 = vsub.f32 %v867_v60, %v2253_v31  ;;  %1144 = vst [vmem:[%s2228_s6 + $0xa0] sm:$0xff] %v867_v60  ;;  %v872_v63 = vmul.f32 %v2257_v35, %v867_v60  ;;  %v692_v60 = vadd.f32 %v2250_v25, %v2393_v49  ;;  %v695_v49 = vadd.f32 %v2250_v25, %v2399_v10 }
 0x23b   : > { %vm869_vm4 = vcmp.gt.f32.partialorder %v868_v5, 0.0 }
 0x23c   : > { %v1412_v42 = vsel %vm869_vm4, 1.0, %v1980_v37 }
 0x23d   : > { %v873_v1 = vsub.f32 1.0, %v1412_v42 }
 0x23f   : > { %v874_v2 = vmul.f32 %v873_v1, %v872_v63 }
 0x241   : > { %v875_v4 = vadd.f32 %v874_v2, %v663_v29 }
 0x243   : > { %v876_v6 = vsub.f32 %v875_v4, %v2253_v31  ;;  %1145 = vst [vmem:[%s2228_s6 + $0xa8] sm:$0xff] %v875_v4  ;;  %v880_v9 = vmul.f32 %v2257_v35, %v875_v4 }
 0x245   : > { %vm877_vm5 = vcmp.gt.f32.partialorder %v876_v6, 0.0 }
 0x246   : > { %v1413_v61 = vsel %vm877_vm5, 1.0, %v1980_v37 }
 0x247   : > { %v881_v11 = vsub.f32 1.0, %v1413_v61  ;;  %v1530_v12 = vpack.c.bf16 %v1413_v61, %v1412_v42 }
 0x249   : > { %v882_v14 = vmul.f32 %v881_v11, %v880_v9  ;;  %1556 = vst [vmem:[%s2226_s25 + $0x50] sm:$0xff] %v1530_v12  }
 0x24b   : > { %v883_v15 = vadd.f32 %v882_v14, %v668_v13 }
 0x24d   : > { %1146 = vst [vmem:[%s2228_s6 + $0xb0] sm:$0xff] %v883_v15  ;;  %v884_v47 = vsub.f32 %v883_v15, %v2253_v31  ;;  %v888_v17 = vmul.f32 %v2257_v35, %v883_v15 }
 0x24f   : > { %vm885_vm6 = vcmp.gt.f32.partialorder %v884_v47, 0.0  ;;  %v700_v47 = vadd.f32 %v2390_v3, %v2250_v25  ;;  %v703_v3 = vadd.f32 %v2395_v7, %v2250_v25 }
 0x250   : > { %v1414_v16 = vsel %vm885_vm6, 1.0, %v1980_v37 }
 0x251   : > { %v889_v0 = vsub.f32 1.0, %v1414_v16 }
 0x253   : > { %v890_v18 = vmul.f32 %v889_v0, %v888_v17 }
 0x255   : > { %v891_v20 = vadd.f32 %v890_v18, %v671_v53 }
 0x257   : > { %v892_v27 = vsub.f32 %v891_v20, %v2253_v31  ;;  %1147 = vst [vmem:[%s2228_s6 + $0xb8] sm:$0xff] %v891_v20  ;;  %v896_v54 = vmul.f32 %v2257_v35, %v891_v20 }
 0x259   : > { %vm893_vm7 = vcmp.gt.f32.partialorder %v892_v27, 0.0 }
 0x25a   : > { %v1415_v21 = vsel %vm893_vm7, 1.0, %v1980_v37 }
 0x25b   : > { %v897_v24 = vsub.f32 1.0, %v1415_v21  ;;  %v1533_v28 = vpack.c.bf16 %v1415_v21, %v1414_v16 }
 0x25d   : > { %v898_v30 = vmul.f32 %v897_v24, %v896_v54  ;;  %1557 = vst [vmem:[%s2226_s25 + $0x58] sm:$0xff] %v1533_v28  }
 0x25f   : > { %v899_v32 = vadd.f32 %v898_v30, %v676_v48 }
 0x261   : > { %v900_v45 = vsub.f32 %v899_v32, %v2253_v31  ;;  %1148 = vst [vmem:[%s2228_s6 + $0xc0] sm:$0xff] %v899_v32  ;;  %v904_v34 = vmul.f32 %v2257_v35, %v899_v32 }
 0x263   : > { %vm901_vm8 = vcmp.gt.f32.partialorder %v900_v45, 0.0 }
 0x264   : > { %v1416_v33 = vsel %vm901_vm8, 1.0, %v1980_v37 }
 0x265   : > { %v905_v38 = vsub.f32 1.0, %v1416_v33 }
 0x267   : > { %v906_v39 = vmul.f32 %v905_v38, %v904_v34 }
 0x269   : > { %v907_v50 = vadd.f32 %v906_v39, %v679_v22 }
 0x26b   : > { %v908_v40 = vsub.f32 %v907_v50, %v2253_v31  ;;  %1149 = vst [vmem:[%s2228_s6 + $0xc8] sm:$0xff] %v907_v50  ;;  %v912_v41 = vmul.f32 %v2257_v35, %v907_v50 }
 0x26d   : > { %vm909_vm9 = vcmp.gt.f32.partialorder %v908_v40, 0.0 }
 0x26e   : > { %v1417_v8 = vsel %vm909_vm9, 1.0, %v1980_v37 }
 0x26f   : > { %v913_v43 = vsub.f32 1.0, %v1417_v8  ;;  %v1536_v44 = vpack.c.bf16 %v1417_v8, %v1416_v33 }
 0x271   : > { %v914_v62 = vmul.f32 %v913_v43, %v912_v41  ;;  %1558 = vst [vmem:[%s2226_s25 + $0x60] sm:$0xff] %v1536_v44  }
 0x273   : > { %v915_v36 = vadd.f32 %v914_v62, %v684_v46 }
 0x275   : > { %1150 = vst [vmem:[%s2228_s6 + $0xd0] sm:$0xff] %v915_v36  ;;  %v916_v26 = vsub.f32 %v915_v36, %v2253_v31  ;;  %v920_v52 = vmul.f32 %v2257_v35, %v915_v36 }
 0x277   : > { %vm917_vm10 = vcmp.gt.f32.partialorder %v916_v26, 0.0 }
 0x278   : > { %v1418_v51 = vsel %vm917_vm10, 1.0, %v1980_v37 }
 0x279   : > { %v921_v55 = vsub.f32 1.0, %v1418_v51 }
 0x27b   : > { %v922_v57 = vmul.f32 %v921_v55, %v920_v52 }
 0x27d   : > { %v923_v58 = vadd.f32 %v922_v57, %v687_v56 }
 0x27f   : > { %v924_v19 = vsub.f32 %v923_v58, %v2253_v31  ;;  %1151 = vst [vmem:[%s2228_s6 + $0xd8] sm:$0xff] %v923_v58  ;;  %v928_v5 = vmul.f32 %v2257_v35, %v923_v58 }
 0x281   : > { %vm925_vm11 = vcmp.gt.f32.partialorder %v924_v19, 0.0 }
 0x282   : > { %v1419_v59 = vsel %vm925_vm11, 1.0, %v1980_v37 }
 0x283   : > { %v929_v42 = vsub.f32 1.0, %v1419_v59  ;;  %v1539_v63 = vpack.c.bf16 %v1419_v59, %v1418_v51 }
 0x285   : > { %v930_v1 = vmul.f32 %v929_v42, %v928_v5  ;;  %1559 = vst [vmem:[%s2226_s25 + $0x68] sm:$0xff] %v1539_v63  }
 0x287   : > { %v931_v29 = vadd.f32 %v930_v1, %v692_v60 }
 0x289   : > { %v932_v23 = vsub.f32 %v931_v29, %v2253_v31  ;;  %1152 = vst [vmem:[%s2228_s6 + $0xe0] sm:$0xff] %v931_v29  ;;  %v936_v4 = vmul.f32 %v2257_v35, %v931_v29 }
 0x28b   : > { %vm933_vm12 = vcmp.gt.f32.partialorder %v932_v23, 0.0 }
 0x28c   : > { %v1420_v2 = vsel %vm933_vm12, 1.0, %v1980_v37 }
 0x28d   : > { %v937_v6 = vsub.f32 1.0, %v1420_v2 }
 0x28f   : > { %v938_v61 = vmul.f32 %v937_v6, %v936_v4 }
 0x291   : > { %v939_v9 = vadd.f32 %v938_v61, %v695_v49 }
 0x293   : > { %v940_v11 = vsub.f32 %v939_v9, %v2253_v31  ;;  %1153 = vst [vmem:[%s2228_s6 + $0xe8] sm:$0xff] %v939_v9  ;;  %v944_v13 = vmul.f32 %v2257_v35, %v939_v9 }
 0x295   : > { %vm941_vm13 = vcmp.gt.f32.partialorder %v940_v11, 0.0 }
 0x296   : > { %v1421_v12 = vsel %vm941_vm13, 1.0, %v1980_v37 }
 0x297   : > { %v945_v14 = vsub.f32 1.0, %v1421_v12  ;;  %v1542_v15 = vpack.c.bf16 %v1421_v12, %v1420_v2 }
 0x299   : > { %v946_v16 = vmul.f32 %v945_v14, %v944_v13  ;;  %1560 = vst [vmem:[%s2226_s25 + $0x70] sm:$0xff] %v1542_v15  }
 0x29b   : > { %v947_v10 = vadd.f32 %v946_v16, %v700_v47 }
 0x29d   : > { %v948_v17 = vsub.f32 %v947_v10, %v2253_v31  ;;  %1154 = vst [vmem:[%s2228_s6 + $0xf0] sm:$0xff] %v947_v10  ;;  %v952_v53 = vmul.f32 %v2257_v35, %v947_v10 }
 0x29f   : > { %vm949_vm14 = vcmp.gt.f32.partialorder %v948_v17, 0.0 }
 0x2a0   : > { %v1422_v0 = vsel %vm949_vm14, 1.0, %v1980_v37 }
 0x2a1   : > { %v953_v18 = vsub.f32 1.0, %v1422_v0 }
 0x2a3   : > { %v954_v20 = vmul.f32 %v953_v18, %v952_v53 }
 0x2a5   : > { %v955_v27 = vadd.f32 %v954_v20, %v703_v3 }
 0x2a7   : > { %v956_v21 = vsub.f32 %v955_v27, %v2253_v31  ;;  %1155 = vst [vmem:[%s2228_s6 + $0xf8] sm:$0xff] %v955_v27 }
 0x2a8   : > { %1868 = shalt.err (!%p1865_p0)
}
 0x2a9   : > { %s1869_s6 = scalar_lea.hbm %s2510_s7, 4096  ;;  %s1873_s16 = scalar_lea.hbm %s2608_s5, 8192 }
 0x2aa   : > { %p1870_p4 = scmp.ne.s32.totalorder %s2510_s7, %s1869_s6  ;;  %p1874_p7 = scmp.lt.u32.totalorder %s2510_s7, %s2608_s5 }
 0x2ab   : > { %p1875_p2 = scmp.lt.u32.totalorder %s1873_s16, %s1869_s6  ;;  %p1877_p12 = scmp.lt.u32.totalorder %s1869_s6, %s2510_s7 }
 0x2ac   : > { %p1871_p13 = pnand %p1870_p4, %p2625_p1 }
 0x2ad   : > { %p1876_p8 = por %p1875_p2, %p1874_p7 }
 0x2ae   : > { %p1872_p6 = pneg %p1871_p13 }
 0x2af   : > { %p1878_p10 = por %p1877_p12, %p1876_p8 }
 0x2b1   : > { %p1879_p3 = pnand %p1878_p10, %p1872_p6 }
 0x2b3   : > { %1882 = shalt.err (!%p1879_p3)
}
 0x2b4   : > { %s1982_s10 = smov 128   ;;  %s1983_s11 = smov 8   ;;  %vm957_vm15 = vcmp.gt.f32.partialorder %v956_v21, 0.0  ;;  %v960_v31 = vmul.f32 %v2257_v35, %v955_v27 }
 0x2b5   : > { %1661 = dma.vmem_to_hbm [thread:$0]  (%p2625_p1), %s2512_s28, 4096, %s2510_s7, %s1162_s15, %s1982_s10, %s1982_s10, %s1983_s11   ;;  %v1423_v25 = vsel %vm957_vm15, 1.0, %v1980_v37 }
 0x2b6   : > { %s2548_s13 = scalar_lea.hbm %s2607_s4, %s1497_s14  ;;  %v961_v7 = vsub.f32 1.0, %v1423_v25  ;;  %v1545_v48 = vpack.c.bf16 %v1423_v25, %v1422_v0  ;;  %s1157_s28 = scalar_lea.sflag [#allocation5], %s2211_s24 }
 0x2b7   : > { %s1883_s7 = scalar_lea.vmem %s2552_s27, 2048  ;;  %s1984_s21 = smov [#allocation9]  }
 0x2b8   : > { %v962_v54 = vmul.f32 %v961_v7, %v960_v31  ;;  %1561 = vst [vmem:[%s2226_s25 + $0x78] sm:$0xff] %v1545_v48   ;;  %p1884_p5 = scmp.ne.s32.totalorder %s2552_s27, %s1883_s7  ;;  %s1887_s14 = sshll.u32 %s1984_s21, 4  ;;  %s1888_s14 = int_to_ptr.vmem [resolvable:$false] %s1887_s14 }
 0x2b9   : > { %s1889_s15 = scalar_lea.vmem %s1888_s14, 4096  ;;  %p1890_p0 = scmp.lt.s32.totalorder %s2552_s27, %s1888_s14 }
 0x2ba   : > { %p1885_p9 = pnand %p1884_p5, %p2625_p1  ;;  %p1891_p4 = scmp.lt.s32.totalorder %s1889_s15, %s1883_s7 }
 0x2bc   : > { %p1886_p11 = pneg %p1885_p9  ;;  %p1892_p13 = por %p1891_p4, %p1890_p0 }
 0x2be   : > { %p1893_p6 = pnand %p1892_p13, %p1886_p11 }
 0x2c0   : > { %1896 = shalt.err (!%p1893_p6)
}
 0x2c1   : > { %s1897_s25 = scalar_lea.hbm %s2548_s13, 2048  ;;  %s1901_s9 = scalar_lea.hbm %s2607_s4, 4096 }
 0x2c2   : > { %p1898_p7 = scmp.ne.s32.totalorder %s2548_s13, %s1897_s25  ;;  %p1902_p12 = scmp.lt.u32.totalorder %s2548_s13, %s2607_s4 }
 0x2c3   : > { %p1903_p10 = scmp.lt.u32.totalorder %s1901_s9, %s1897_s25  ;;  %p1905_p5 = scmp.lt.u32.totalorder %s1897_s25, %s2548_s13 }
 0x2c4   : > { %p1899_p2 = pnand %p1898_p7, %p2625_p1 }
 0x2c5   : > { %p1904_p3 = por %p1903_p10, %p1902_p12 }
 0x2c6   : > { %p1900_p8 = pneg %p1899_p2 }
 0x2c7   : > { %p1906_p9 = por %p1905_p5, %p1904_p3 }
 0x2c9   : > { %p1907_p11 = pnand %p1906_p9, %p1900_p8 }
 0x2cb   : > { %1910 = shalt.err (!%p1907_p11)
}
 0x2cc   : > { %s1985_s6 = smov 64   ;;  %s1986_s26 = smov 4   ;;  %963 = vst [vmem:[#allocation2] sm:$0xff] %v962_v54 }
 0x2cd   : > { %1660 = dma.vmem_to_hbm [thread:$0]  (%p2625_p1), %s2552_s27, 2048, %s2548_s13, %s1157_s28, %s1985_s6, %s1985_s6, %s1986_s26  }
 0x2ce PF: > { %s1208_s7 = sand.u32 1, %s1953_s18   ;;  %p2626_p0 = scmp.ne.s32.totalorder %s2617_s29, 0 }
 0x2cf   : > { %p2627_p4 = scmp.ge.s32.totalorder %s1973_s23, 2  ;;  %s1209_s21 = scalar_lea.sflag [#allocation5], %s1208_s7 }
 0x2d1   : > { %p1676_p13 = pnand %p2627_p4, %p2626_p0 }
 0x2d3   : > { %1944 = dma.done.wait (!%p1676_p13), %s1209_s21, 2048  }
 0x2d4   : > { %1946 = vsyncadd (!%p1676_p13), %s1209_s21, 4294965248  ;;  %s1218_s14 = scalar_lea.sflag [#allocation11], %s1208_s7 }
 0x2d5   : > { %1948 = dma.done.wait (!%p1676_p13), %s1218_s14, 4096  }
 0x2d6   : > { %1950 = vsyncadd (!%p1676_p13), %s1218_s14, 4294963200  ;;  %s26_s23 = sadd.s32 1, %s1973_s23   ;;  %s2628_s18 = smov %s1957_s19 }
 0x2d7   : > { %p23_p6 = scmp.ge.s32.totalorder %s26_s23, 4   ;;  %s2629_s19 = smov %s1961_s20 }
 0x2d8   : > { %s2630_s20 = smov %s2162_s17  ;;  %s2631_s21 = smov %s1969_s22 }
 0x2d9   : > { %s2632_s22 = smov %s2634_s12  ;;  %25 = sbr.rel (!%p23_p6) target bundleno = 9 (0x9), region = 115 }
 0x2e0   :  { %1223 = vsyncpa [#allocation4], 1 }
 0x2e1   :  { %1225 = vsyncpa [#allocation4 + $0x1], 1 }
 0x2e2   :  { %1226 = vsyncpa [#allocation7], 1 }
 0x2e3   :  { %1227 = vsyncpa [#allocation5], 1 }
 0x2e4   :  { %1229 = vsyncpa [#allocation5 + $0x1], 1 }
 0x2e5   :  { %1230 = vsyncpa [#allocation11], 1 }
 0x2e6   :  { %1232 = vsyncpa [#allocation11 + $0x1], 1 }

</bundles_post_ra>
